<compile_context>
chip_gen: v5e
topology: v5e:2x2
jax: 0.10.0
libtpu: 0.0.40
codegen_flags: <defaults>
</compile_context>

<pallas_src>
import functools

import jax
import jax.numpy as jnp
from jax.experimental import pallas as pl
from jax.experimental.pallas import tpu as pltpu

EPS = 1e-6


def _feature_map(x):
    # elu(x) + 1  ==  x + 1 for x > 0, exp(x) for x <= 0.
    # NOTE: jnp.where evaluates both branches; exp() is taken on min(x, 0) so the
    # untaken branch never produces inf — do not "simplify" this.
    return jnp.where(x > 0, x + 1.0, jnp.exp(jnp.minimum(x, 0.0)))


def _exact_expand(x, sel):
    """x @ sel on the MXU, exactly in f32, where sel is a 0/1 selection matrix.

    x (f32) is split into three bf16 pieces (bf16x3).  Each output lane picks up
    exactly one nonzero product per piece, so the f32 accumulation reconstructs
    the original f32 value (to ~1 ulp).  The MXU is idle in this HBM-bound
    kernel, so the lane expansion is essentially free.
    """
    x1 = x.astype(jnp.bfloat16)
    r1 = x - x1.astype(jnp.float32)
    x2 = r1.astype(jnp.bfloat16)
    x3 = (r1 - x2.astype(jnp.float32)).astype(jnp.bfloat16)
    out = jnp.dot(x1, sel, preferred_element_type=jnp.float32)
    out = out + jnp.dot(x2, sel, preferred_element_type=jnp.float32)
    out = out + jnp.dot(x3, sel, preferred_element_type=jnp.float32)
    return out


def _strided_group_sum(p, groups, m):
    """sum_d p[..., d*m + j] -> (..., m); p has trailing dim groups*m."""
    if groups > 0 and (groups & (groups - 1)) == 0:
        # Power-of-two group count: log2(groups) lane folds on dense vregs.
        width = groups * m
        while width > m:
            half = width // 2
            p = p[..., :half] + p[..., half:]
            width = half
        return p
    # Generic fallback (rare head dims): accumulate group by group.
    acc = p[..., 0:m]
    for d in range(1, groups):
        acc = acc + p[..., d * m:(d + 1) * m]
    return acc


def _rla_kernel(q_ref, k_ref, v_ref, zi_ref, si_ref, e_ref, t_ref,
                vout_ref, zi_out_ref, si_out_ref, *, eps):
    f32 = jnp.float32
    q = q_ref[...].astype(f32)        # (Bb, D)
    k = k_ref[...].astype(f32)        # (Bb, D)
    v = v_ref[...].astype(f32)        # (Bb, M)
    zi = zi_ref[...]                  # (Bb, D)    f32 state
    si = si_ref[...]                  # (Bb, D*M)  f32 state, lane-dense
    e_sel = e_ref[...]                # (D, D*M) bf16: E[d, d*M+m] = 1
    t_sel = t_ref[...]                # (M, D*M) bf16: T[m, d*M+m] = 1

    D = q.shape[-1]
    M = v.shape[-1]

    Q = _feature_map(q)
    K = _feature_map(k)

    # --- Zi update -------------------------------------------------------
    zi_new = zi + K
    zi_out_ref[...] = zi_new

    # --- Si update: Si += K ⊗ v, computed directly in the (d*M+m) layout ---
    k_exp = _exact_expand(K, e_sel)       # (Bb, DM): K[b, d] at lane d*M+m
    v_tld = _exact_expand(v, t_sel)       # (Bb, DM): v[b, m] at lane d*M+m
    si_out_ref[...] = si + k_exp * v_tld  # lane-dense, unmasked full-row stores

    # --- V numerator, algebraically split so Si_new is not kept live:
    #     sum_d Q*Si_new = sum_d Q*Si_old + (sum_d Q*K) * v
    q_exp = _exact_expand(Q, e_sel)                           # (Bb, DM)
    num_old = _strided_group_sum(q_exp * si, D, M)            # (Bb, M)
    qk = jnp.sum(Q * K, axis=-1, keepdims=True)               # (Bb, 1)
    num = num_old + qk * v                                    # (Bb, M)

    denom = jnp.sum(Q * zi_new, axis=-1, keepdims=True) + eps  # (Bb, 1)
    vout_ref[...] = (num * pl.reciprocal(denom, approx=False)).astype(vout_ref.dtype)


def _selection_matrices(d, m):
    """Constant 0/1 expansion matrices (built in plain JAX, passed as inputs)."""
    dm = d * m
    lane = jnp.arange(dm, dtype=jnp.int32)
    e = (lane[None, :] // m) == jnp.arange(d, dtype=jnp.int32)[:, None]  # (D, DM)
    t = (lane[None, :] % m) == jnp.arange(m, dtype=jnp.int32)[:, None]   # (M, DM)
    return e.astype(jnp.bfloat16), t.astype(jnp.bfloat16)


def _pick_block_rows(b, dm, elem_bytes=4, target_bytes=1 << 20):
    """Rows per grid step: ~1 MiB of Si payload, multiple of 8, dividing b."""
    bb = min(b, max(8, target_bytes // (dm * elem_bytes)))
    bb -= bb % 8
    while bb > 8 and b % bb:
        bb -= 8
    if bb < 8 or b % bb:
        return b                       # tiny / odd batch: one full-extent block
    if bb == b and b >= 16 and (b // 2) % 8 == 0:
        bb = b // 2                    # keep >=2 grid steps (v7x megacore)
    return bb


def recurrent_linear_attention(query, key, value, memory=None, eps=EPS):
    """One recurrent step of causal linear attention.

    Returns (V, [Si, Zi]) exactly like the PyTorch module's forward; the
    recurrent state Si/Zi is kept in float32 regardless of activation dtype.
    """
    N, H, D = query.shape
    M = value.shape[-1]
    B, DM = N * H, D * M

    if memory is None:
        si = jnp.zeros((B, DM), jnp.float32)
        zi = jnp.zeros((B, D), jnp.float32)
    else:
        Si, Zi = memory
        if Si.shape[0] != N:
            raise ValueError("The batch size changed during iteration")
        si = jnp.asarray(Si).reshape(B, DM).astype(jnp.float32)   # free reshape
        zi = jnp.asarray(Zi).reshape(B, D).astype(jnp.float32)

    q2 = query.reshape(B, D)
    k2 = key.reshape(B, D)
    v2 = value.reshape(B, M)
    e_sel, t_sel = _selection_matrices(D, M)

    bb = _pick_block_rows(B, DM)
    grid = (B // bb,)
    row = lambda i: (i, 0)
    const = lambda i: (0, 0)

    cost = pl.CostEstimate(
        flops=int(6 * B * DM * (2 * D + M) + 8 * B * DM),
        transcendentals=int(2 * B * D),
        bytes_accessed=int(4 * (2 * B * DM + 4 * B * D + 2 * B * M)
                           + 2 * (D + M) * DM),
    )

    V, zi_new, si_new = pl.pallas_call(
        functools.partial(_rla_kernel, eps=eps),
        out_shape=(
            jax.ShapeDtypeStruct((B, M), query.dtype),
            jax.ShapeDtypeStruct((B, D), jnp.float32),
            jax.ShapeDtypeStruct((B, DM), jnp.float32),
        ),
        grid=grid,
        in_specs=[
            pl.BlockSpec((bb, D), row),     # q
            pl.BlockSpec((bb, D), row),     # k
            pl.BlockSpec((bb, M), row),     # v
            pl.BlockSpec((bb, D), row),     # Zi  (aliased -> out 1)
            pl.BlockSpec((bb, DM), row),    # Si  (aliased -> out 2), lane-dense
            pl.BlockSpec((D, DM), const),   # E selection matrix (fetched once)
            pl.BlockSpec((M, DM), const),   # T selection matrix (fetched once)
        ],
        out_specs=(
            pl.BlockSpec((bb, M), row),
            pl.BlockSpec((bb, D), row),
            pl.BlockSpec((bb, DM), row),
        ),
        input_output_aliases={3: 1, 4: 2},  # update recurrent state in place
        compiler_params=pltpu.CompilerParams(
            dimension_semantics=("parallel",),
            vmem_limit_bytes=48 * 1024 * 1024,
        ),
        cost_estimate=cost,
    )(q2, k2, v2, zi, si, e_sel, t_sel)

    return (V.reshape(N, H, M),
            [si_new.reshape(N, H, D, M), zi_new.reshape(N, H, D)])


def _reference(query, key, value, memory=None, eps=EPS):
    """Pure-JAX (broadcast-only, f32) reference mirroring the PyTorch forward."""
    Q = _feature_map(query.astype(jnp.float32))
    K = _feature_map(key.astype(jnp.float32))
    v = value.astype(jnp.float32)
    N, H, D = Q.shape
    M = v.shape[-1]
    if memory is None:
        Si = jnp.zeros((N, H, D, M), jnp.float32)
        Zi = jnp.zeros((N, H, D), jnp.float32)
    else:
        Si = memory[0].astype(jnp.float32)
        Zi = memory[1].astype(jnp.float32)
    Zi = Zi + K
    Si = Si + K[..., :, None] * v[..., None, :]
    Z = 1.0 / (jnp.sum(Q * Zi, axis=-1) + eps)
    V = jnp.sum(Q[..., :, None] * Si, axis=-2) * Z[..., None]
    return V.astype(query.dtype), [Si, Zi]


if __name__ == "__main__":
    # Small deterministic shapes: batch N=4, heads H=4, query dim D=32, value dim M=32.
    # B = N*H = 16 -> two grid steps of 8 rows each (exercises tiling + aliasing).
    N, H, D, M = 4, 4, 32, 32
    key0 = jax.random.PRNGKey(0)
    kq, kk, kv = jax.random.split(key0, 3)
    query = jax.random.normal(kq, (N, H, D), dtype=jnp.float32)
    key_ = jax.random.normal(kk, (N, H, D), dtype=jnp.float32)
    value = jax.random.normal(kv, (N, H, M), dtype=jnp.float32)

    # Step 1: memory=None (zeros), Step 2: feed back the returned memory.
    V1, mem1 = recurrent_linear_attention(query, key_, value, memory=None)
    V2, mem2 = recurrent_linear_attention(query, key_, value, memory=mem1)
    jax.block_until_ready((V1, mem1, V2, mem2))

    # Correctness check against the pure-JAX reference.
    V1_ref, mem1_ref = _reference(query, key_, value, None)
    V2_ref, mem2_ref = _reference(query, key_, value, mem1_ref)

    atol = rtol = 1e-5
    assert jnp.allclose(V1, V1_ref, atol=atol, rtol=rtol)
    assert jnp.allclose(mem1[0], mem1_ref[0], atol=atol, rtol=rtol)
    assert jnp.allclose(mem1[1], mem1_ref[1], atol=atol, rtol=rtol)
    assert jnp.allclose(V2, V2_ref, atol=atol, rtol=rtol)
    assert jnp.allclose(mem2[0], mem2_ref[0], atol=atol, rtol=rtol)
    assert jnp.allclose(mem2[1], mem2_ref[1], atol=atol, rtol=rtol)

    print("KERNEL_OK")
</pallas_src>

<mosaic_0001>
module attributes {stable_mosaic.version = 11 : i64} {
  func.func @_rla_kernel(%arg0: i32, %arg1: memref<8x32xf32, #tpu.memory_space<vmem>>, %arg2: memref<8x32xf32, #tpu.memory_space<vmem>>, %arg3: memref<8x32xf32, #tpu.memory_space<vmem>>, %arg4: memref<8x32xf32, #tpu.memory_space<vmem>>, %arg5: memref<8x1024xf32, #tpu.memory_space<vmem>>, %arg6: memref<32x1024xbf16, #tpu.memory_space<vmem>>, %arg7: memref<32x1024xbf16, #tpu.memory_space<vmem>>, %arg8: memref<8x32xf32, #tpu.memory_space<vmem>>, %arg9: memref<8x32xf32, #tpu.memory_space<vmem>>, %arg10: memref<8x1024xf32, #tpu.memory_space<vmem>>) attributes {dimension_semantics = [#tpu.dimension_semantics<parallel>], iteration_bounds = array<i64: 2>, scalar_prefetch = 0 : i64, scratch_operands = 0 : i64, tpu.core_type = #tpu.core_type<tc>, window_params = [{transform_indices = @transform_0, window_bounds = array<i64: 8, 32>}, {transform_indices = @transform_1, window_bounds = array<i64: 8, 32>}, {transform_indices = @transform_2, window_bounds = array<i64: 8, 32>}, {transform_indices = @transform_3, window_bounds = array<i64: 8, 32>}, {transform_indices = @transform_4, window_bounds = array<i64: 8, 1024>}, {pipeline_mode = #tpu.pipeline_mode<synchronous>, transform_indices = @transform_5, window_bounds = array<i64: 32, 1024>}, {pipeline_mode = #tpu.pipeline_mode<synchronous>, transform_indices = @transform_6, window_bounds = array<i64: 32, 1024>}, {transform_indices = @transform_7, window_bounds = array<i64: 8, 32>}, {transform_indices = @transform_8, window_bounds = array<i64: 8, 32>}, {transform_indices = @transform_9, window_bounds = array<i64: 8, 1024>}]} {
    %c0 = arith.constant 0 : index
    %c0_0 = arith.constant 0 : index
    %0 = vector.load %arg1[%c0, %c0_0] : memref<8x32xf32, #tpu.memory_space<vmem>>, vector<8x32xf32>
    %c0_1 = arith.constant 0 : index
    %c0_2 = arith.constant 0 : index
    %1 = vector.load %arg2[%c0_1, %c0_2] : memref<8x32xf32, #tpu.memory_space<vmem>>, vector<8x32xf32>
    %c0_3 = arith.constant 0 : index
    %c0_4 = arith.constant 0 : index
    %2 = vector.load %arg3[%c0_3, %c0_4] : memref<8x32xf32, #tpu.memory_space<vmem>>, vector<8x32xf32>
    %c0_5 = arith.constant 0 : index
    %c0_6 = arith.constant 0 : index
    %3 = vector.load %arg4[%c0_5, %c0_6] : memref<8x32xf32, #tpu.memory_space<vmem>>, vector<8x32xf32>
    %c0_7 = arith.constant 0 : index
    %c0_8 = arith.constant 0 : index
    %4 = vector.load %arg5[%c0_7, %c0_8] : memref<8x1024xf32, #tpu.memory_space<vmem>>, vector<8x1024xf32>
    %c0_9 = arith.constant 0 : index
    %c0_10 = arith.constant 0 : index
    %5 = vector.load %arg6[%c0_9, %c0_10] : memref<32x1024xbf16, #tpu.memory_space<vmem>>, vector<32x1024xbf16>
    %c0_11 = arith.constant 0 : index
    %c0_12 = arith.constant 0 : index
    %6 = vector.load %arg7[%c0_11, %c0_12] : memref<32x1024xbf16, #tpu.memory_space<vmem>>, vector<32x1024xbf16>
    %cst = arith.constant 0.000000e+00 : f32
    %7 = vector.broadcast %cst : f32 to vector<8x32xf32>
    %8 = arith.cmpf ogt, %0, %7 : vector<8x32xf32>
    %cst_13 = arith.constant 1.000000e+00 : f32
    %9 = vector.broadcast %cst_13 : f32 to vector<8x32xf32>
    %10 = arith.addf %0, %9 : vector<8x32xf32>
    %cst_14 = arith.constant 0.000000e+00 : f32
    %11 = vector.broadcast %cst_14 : f32 to vector<8x32xf32>
    %12 = arith.minimumf %0, %11 : vector<8x32xf32>
    %13 = math.exp %12 : vector<8x32xf32>
    %14 = arith.select %8, %10, %13 : vector<8x32xi1>, vector<8x32xf32>
    %cst_15 = arith.constant 0.000000e+00 : f32
    %15 = vector.broadcast %cst_15 : f32 to vector<8x32xf32>
    %16 = arith.cmpf ogt, %1, %15 : vector<8x32xf32>
    %cst_16 = arith.constant 1.000000e+00 : f32
    %17 = vector.broadcast %cst_16 : f32 to vector<8x32xf32>
    %18 = arith.addf %1, %17 : vector<8x32xf32>
    %cst_17 = arith.constant 0.000000e+00 : f32
    %19 = vector.broadcast %cst_17 : f32 to vector<8x32xf32>
    %20 = arith.minimumf %1, %19 : vector<8x32xf32>
    %21 = math.exp %20 : vector<8x32xf32>
    %22 = arith.select %16, %18, %21 : vector<8x32xi1>, vector<8x32xf32>
    %23 = arith.addf %3, %22 : vector<8x32xf32>
    %c0_18 = arith.constant 0 : index
    %c0_19 = arith.constant 0 : index
    %24 = vector.load %arg9[%c0_18, %c0_19] : memref<8x32xf32, #tpu.memory_space<vmem>>, vector<8x32xf32>
    tpu.vector_store %arg9[%c0_18, %c0_19], %23 {strides = array<i32>} : memref<8x32xf32, #tpu.memory_space<vmem>>, vector<8x32xf32>,
    %25 = arith.truncf %22 : vector<8x32xf32> to vector<8x32xbf16>
    %26 = arith.extf %25 : vector<8x32xbf16> to vector<8x32xf32>
    %27 = arith.subf %22, %26 : vector<8x32xf32>
    %28 = arith.truncf %27 : vector<8x32xf32> to vector<8x32xbf16>
    %29 = arith.extf %28 : vector<8x32xbf16> to vector<8x32xf32>
    %30 = arith.subf %27, %29 : vector<8x32xf32>
    %31 = arith.truncf %30 : vector<8x32xf32> to vector<8x32xbf16>
    %cst_20 = arith.constant dense<0.000000e+00> : vector<8x1024xf32>
    %32 = tpu.matmul %25, %5, %cst_20 {dimension_numbers = #tpu.dot_dimension_numbers<[1], [0], [0], [1], [0, 0, 1, 1], [], []>} : vector<8x32xbf16>, vector<32x1024xbf16>, vector<8x1024xf32> -> vector<8x1024xf32>
    %cst_21 = arith.constant dense<0.000000e+00> : vector<8x1024xf32>
    %33 = tpu.matmul %28, %5, %cst_21 {dimension_numbers = #tpu.dot_dimension_numbers<[1], [0], [0], [1], [0, 0, 1, 1], [], []>} : vector<8x32xbf16>, vector<32x1024xbf16>, vector<8x1024xf32> -> vector<8x1024xf32>
    %34 = arith.addf %32, %33 : vector<8x1024xf32>
    %cst_22 = arith.constant dense<0.000000e+00> : vector<8x1024xf32>
    %35 = tpu.matmul %31, %5, %cst_22 {dimension_numbers = #tpu.dot_dimension_numbers<[1], [0], [0], [1], [0, 0, 1, 1], [], []>} : vector<8x32xbf16>, vector<32x1024xbf16>, vector<8x1024xf32> -> vector<8x1024xf32>
    %36 = arith.addf %34, %35 : vector<8x1024xf32>
    %37 = arith.truncf %2 : vector<8x32xf32> to vector<8x32xbf16>
    %38 = arith.extf %37 : vector<8x32xbf16> to vector<8x32xf32>
    %39 = arith.subf %2, %38 : vector<8x32xf32>
    %40 = arith.truncf %39 : vector<8x32xf32> to vector<8x32xbf16>
    %41 = arith.extf %40 : vector<8x32xbf16> to vector<8x32xf32>
    %42 = arith.subf %39, %41 : vector<8x32xf32>
    %43 = arith.truncf %42 : vector<8x32xf32> to vector<8x32xbf16>
    %cst_23 = arith.constant dense<0.000000e+00> : vector<8x1024xf32>
    %44 = tpu.matmul %37, %6, %cst_23 {dimension_numbers = #tpu.dot_dimension_numbers<[1], [0], [0], [1], [0, 0, 1, 1], [], []>} : vector<8x32xbf16>, vector<32x1024xbf16>, vector<8x1024xf32> -> vector<8x1024xf32>
    %cst_24 = arith.constant dense<0.000000e+00> : vector<8x1024xf32>
    %45 = tpu.matmul %40, %6, %cst_24 {dimension_numbers = #tpu.dot_dimension_numbers<[1], [0], [0], [1], [0, 0, 1, 1], [], []>} : vector<8x32xbf16>, vector<32x1024xbf16>, vector<8x1024xf32> -> vector<8x1024xf32>
    %46 = arith.addf %44, %45 : vector<8x1024xf32>
    %cst_25 = arith.constant dense<0.000000e+00> : vector<8x1024xf32>
    %47 = tpu.matmul %43, %6, %cst_25 {dimension_numbers = #tpu.dot_dimension_numbers<[1], [0], [0], [1], [0, 0, 1, 1], [], []>} : vector<8x32xbf16>, vector<32x1024xbf16>, vector<8x1024xf32> -> vector<8x1024xf32>
    %48 = arith.addf %46, %47 : vector<8x1024xf32>
    %49 = arith.mulf %36, %48 : vector<8x1024xf32>
    %50 = arith.addf %4, %49 : vector<8x1024xf32>
    %c0_26 = arith.constant 0 : index
    %c0_27 = arith.constant 0 : index
    %51 = vector.load %arg10[%c0_26, %c0_27] : memref<8x1024xf32, #tpu.memory_space<vmem>>, vector<8x1024xf32>
    tpu.vector_store %arg10[%c0_26, %c0_27], %50 {strides = array<i32>} : memref<8x1024xf32, #tpu.memory_space<vmem>>, vector<8x1024xf32>,
    %52 = arith.truncf %14 : vector<8x32xf32> to vector<8x32xbf16>
    %53 = arith.extf %52 : vector<8x32xbf16> to vector<8x32xf32>
    %54 = arith.subf %14, %53 : vector<8x32xf32>
    %55 = arith.truncf %54 : vector<8x32xf32> to vector<8x32xbf16>
    %56 = arith.extf %55 : vector<8x32xbf16> to vector<8x32xf32>
    %57 = arith.subf %54, %56 : vector<8x32xf32>
    %58 = arith.truncf %57 : vector<8x32xf32> to vector<8x32xbf16>
    %cst_28 = arith.constant dense<0.000000e+00> : vector<8x1024xf32>
    %59 = tpu.matmul %52, %5, %cst_28 {dimension_numbers = #tpu.dot_dimension_numbers<[1], [0], [0], [1], [0, 0, 1, 1], [], []>} : vector<8x32xbf16>, vector<32x1024xbf16>, vector<8x1024xf32> -> vector<8x1024xf32>
    %cst_29 = arith.constant dense<0.000000e+00> : vector<8x1024xf32>
    %60 = tpu.matmul %55, %5, %cst_29 {dimension_numbers = #tpu.dot_dimension_numbers<[1], [0], [0], [1], [0, 0, 1, 1], [], []>} : vector<8x32xbf16>, vector<32x1024xbf16>, vector<8x1024xf32> -> vector<8x1024xf32>
    %61 = arith.addf %59, %60 : vector<8x1024xf32>
    %cst_30 = arith.constant dense<0.000000e+00> : vector<8x1024xf32>
    %62 = tpu.matmul %58, %5, %cst_30 {dimension_numbers = #tpu.dot_dimension_numbers<[1], [0], [0], [1], [0, 0, 1, 1], [], []>} : vector<8x32xbf16>, vector<32x1024xbf16>, vector<8x1024xf32> -> vector<8x1024xf32>
    %63 = arith.addf %61, %62 : vector<8x1024xf32>
    %64 = arith.mulf %63, %4 : vector<8x1024xf32>
    %65 = vector.extract_strided_slice %64 {offsets = [0, 0], sizes = [8, 512], strides = [1, 1]} : vector<8x1024xf32> to vector<8x512xf32>
    %66 = vector.extract_strided_slice %64 {offsets = [0, 512], sizes = [8, 512], strides = [1, 1]} : vector<8x1024xf32> to vector<8x512xf32>
    %67 = arith.addf %65, %66 : vector<8x512xf32>
    %68 = vector.extract_strided_slice %67 {offsets = [0, 0], sizes = [8, 256], strides = [1, 1]} : vector<8x512xf32> to vector<8x256xf32>
    %69 = vector.extract_strided_slice %67 {offsets = [0, 256], sizes = [8, 256], strides = [1, 1]} : vector<8x512xf32> to vector<8x256xf32>
    %70 = arith.addf %68, %69 : vector<8x256xf32>
    %71 = vector.extract_strided_slice %70 {offsets = [0, 0], sizes = [8, 128], strides = [1, 1]} : vector<8x256xf32> to vector<8x128xf32>
    %72 = vector.extract_strided_slice %70 {offsets = [0, 128], sizes = [8, 128], strides = [1, 1]} : vector<8x256xf32> to vector<8x128xf32>
    %73 = arith.addf %71, %72 : vector<8x128xf32>
    %74 = vector.extract_strided_slice %73 {offsets = [0, 0], sizes = [8, 64], strides = [1, 1]} : vector<8x128xf32> to vector<8x64xf32>
    %75 = vector.extract_strided_slice %73 {offsets = [0, 64], sizes = [8, 64], strides = [1, 1]} : vector<8x128xf32> to vector<8x64xf32>
    %76 = arith.addf %74, %75 : vector<8x64xf32>
    %77 = vector.extract_strided_slice %76 {offsets = [0, 0], sizes = [8, 32], strides = [1, 1]} : vector<8x64xf32> to vector<8x32xf32>
    %78 = vector.extract_strided_slice %76 {offsets = [0, 32], sizes = [8, 32], strides = [1, 1]} : vector<8x64xf32> to vector<8x32xf32>
    %79 = arith.addf %77, %78 : vector<8x32xf32>
    %80 = arith.mulf %14, %22 : vector<8x32xf32>
    %cst_31 = arith.constant dense<0.000000e+00> : vector<8xf32>
    %81 = vector.multi_reduction <add>, %80, %cst_31 [1] : vector<8x32xf32> to vector<8xf32>
    %82 = vector.shape_cast %81 : vector<8xf32> to vector<8x1xf32>
    %83 = vector.broadcast %82 : vector<8x1xf32> to vector<8x32xf32>
    %84 = arith.mulf %83, %2 : vector<8x32xf32>
    %85 = arith.addf %79, %84 : vector<8x32xf32>
    %86 = arith.mulf %14, %23 : vector<8x32xf32>
    %cst_32 = arith.constant dense<0.000000e+00> : vector<8xf32>
    %87 = vector.multi_reduction <add>, %86, %cst_32 [1] : vector<8x32xf32> to vector<8xf32>
    %88 = vector.shape_cast %87 : vector<8xf32> to vector<8x1xf32>
    %cst_33 = arith.constant 9.99999997E-7 : f32
    %89 = vector.broadcast %cst_33 : f32 to vector<8x1xf32>
    %90 = arith.addf %88, %89 : vector<8x1xf32>
    %91 = tpu.reciprocal %90 : vector<8x1xf32> -> vector<8x1xf32>
    %92 = vector.broadcast %91 : vector<8x1xf32> to vector<8x32xf32>
    %93 = arith.mulf %85, %92 : vector<8x32xf32>
    %c0_34 = arith.constant 0 : index
    %c0_35 = arith.constant 0 : index
    %94 = vector.load %arg8[%c0_34, %c0_35] : memref<8x32xf32, #tpu.memory_space<vmem>>, vector<8x32xf32>
    tpu.vector_store %arg8[%c0_34, %c0_35], %93 {strides = array<i32>} : memref<8x32xf32, #tpu.memory_space<vmem>>, vector<8x32xf32>,
    return
  }
  func.func @transform_0(%arg0: i32) -> (i32, i32) {
    %c0_i32 = arith.constant 0 : i32
    %c0_i32_0 = arith.constant 0 : i32
    return %arg0, %c0_i32 : i32, i32
  }
  func.func @transform_1(%arg0: i32) -> (i32, i32) {
    %c0_i32 = arith.constant 0 : i32
    %c0_i32_0 = arith.constant 0 : i32
    return %arg0, %c0_i32 : i32, i32
  }
  func.func @transform_2(%arg0: i32) -> (i32, i32) {
    %c0_i32 = arith.constant 0 : i32
    %c0_i32_0 = arith.constant 0 : i32
    return %arg0, %c0_i32 : i32, i32
  }
  func.func @transform_3(%arg0: i32) -> (i32, i32) {
    %c0_i32 = arith.constant 0 : i32
    %c0_i32_0 = arith.constant 0 : i32
    return %arg0, %c0_i32 : i32, i32
  }
  func.func @transform_4(%arg0: i32) -> (i32, i32) {
    %c0_i32 = arith.constant 0 : i32
    %c0_i32_0 = arith.constant 0 : i32
    return %arg0, %c0_i32 : i32, i32
  }
  func.func @transform_5(%arg0: i32) -> (i32, i32) {
    %c0_i32 = arith.constant 0 : i32
    %c0_i32_0 = arith.constant 0 : i32
    %c0_i32_1 = arith.constant 0 : i32
    return %c0_i32, %c0_i32_0 : i32, i32
  }
  func.func @transform_6(%arg0: i32) -> (i32, i32) {
    %c0_i32 = arith.constant 0 : i32
    %c0_i32_0 = arith.constant 0 : i32
    %c0_i32_1 = arith.constant 0 : i32
    return %c0_i32, %c0_i32_0 : i32, i32
  }
  func.func @transform_7(%arg0: i32) -> (i32, i32) {
    %c0_i32 = arith.constant 0 : i32
    %c0_i32_0 = arith.constant 0 : i32
    return %arg0, %c0_i32 : i32, i32
  }
  func.func @transform_8(%arg0: i32) -> (i32, i32) {
    %c0_i32 = arith.constant 0 : i32
    %c0_i32_0 = arith.constant 0 : i32
    return %arg0, %c0_i32 : i32, i32
  }
  func.func @transform_9(%arg0: i32) -> (i32, i32) {
    %c0_i32 = arith.constant 0 : i32
    %c0_i32_0 = arith.constant 0 : i32
    return %arg0, %c0_i32 : i32, i32
  }
}

</mosaic_0001>

<bundles_post_ra>
// kernel: tpu_custom_call.1
= control target key start
LH: loop header
LB: loop body
LE: loop exit
PB: predicated region body
PF: predicated region fallthrough
CT: control target
= control target key end

     0   :  { %s3640_s0 = inlined_call_operand.vmem [shape: f32[16,32], index: 0, kind: input, shape index: {}]   ;;  %s3641_s1 = inlined_call_operand.hbm [shape: f32[16,32], index: 1, kind: input, shape index: {}]   ;;  %s3642_s2 = inlined_call_operand.hbm [shape: f32[16,32], index: 2, kind: input, shape index: {}]   ;;  %s3643_s3 = inlined_call_operand.hbm [shape: f32[16,32], index: 3, kind: input, shape index: {}, may-alias: {3,8}]   ;;  %s3644_s4 = inlined_call_operand.hbm [shape: f32[16,1024], index: 4, kind: input, shape index: {}, may-alias: {4,9}]   ;;  %s3645_s5 = inlined_call_operand.vmem [shape: bf16[32,1024], index: 5, kind: input, shape index: {}]   ;;  %s3646_s6 = inlined_call_operand.vmem [shape: bf16[32,1024], index: 6, kind: input, shape index: {}]   ;;  %s3647_s7 = inlined_call_operand.hbm [shape: f32[16,32], index: 7, kind: output, shape index: {0}]   ;;  %s3648_s8 = inlined_call_operand.hbm [shape: f32[16,32], index: 8, kind: output, shape index: {1}, may-alias: {3,8}]   ;;  %s3649_s9 = inlined_call_operand.hbm [shape: f32[16,1024], index: 9, kind: output, shape index: {2}, may-alias: {4,9}]  }
   0x1   :  { %3659 = sst [smem:[#allocation24_spill]] %s3642_s2 }
   0x2   :  { %3660 = sst [smem:[#allocation25_spill]] %s3647_s7 }
   0x3   :  { %3661 = sst [smem:[#allocation26_spill]] %s3648_s8 }
   0x4   :  { %3662 = sst [smem:[#allocation27_spill]] %s3649_s9 }
   0x5   :  { %15 = vsyncpa [#allocation3], 0 }
   0x6   :  { %17 = vsyncpa [#allocation3 + $0x1], 0 }
   0x7   :  { %18 = vsyncpa [#allocation6], 0 }
   0x8   :  { %20 = vsyncpa [#allocation6 + $0x1], 0 }
   0x9   :  { %21 = vsyncpa [#allocation9], 0 }
   0xa   :  { %23 = vsyncpa [#allocation9 + $0x1], 0 }
   0xb   :  { %24 = vsyncpa [#allocation4], 0 }
   0xc   :  { %26 = vsyncpa [#allocation4 + $0x1], 0 }
   0xd   :  { %27 = vsyncpa [#allocation12], 0 }
   0xe   :  { %29 = vsyncpa [#allocation12 + $0x1], 0  ;;  %s2721_s30 = smov 0   ;;  %s2723_s10 = smov 0  }
   0xf   :  { %s2725_s11 = smov 0   ;;  %s2727_s12 = smov 0  }
  0x10 LB: > { %3663 = sst [smem:[#allocation19_spill]] %s2655_s30  ;;  %s2742_s13 = sadd.s32 4294967295, %s2667_s12   ;;  %s2667_s12 = sphi %s2727_s12, %s3681_s12   ;;  %s2663_s11 = sphi %s2725_s11, %s3683_s11   ;;  %s2659_s10 = sphi %s2723_s10, %s3685_s10   ;;  %s2655_s30 = sphi %s2721_s30, %s3684_s30  }
  0x11   : > { %3664 = sst [smem:[#allocation20_spill]] %s2663_s11  ;;  %s3650_s14 = sadd.s32 4294967294, %s2667_s12  }
  0x12   : > { %s2746_s15 = sadd.s32 1, %s2667_s12   ;;  %s68_s16 = sadd.s32 1, %s2663_s11 }
  0x13   : > { %3665 = sst [smem:[#allocation21_spill]] %s2746_s15  ;;  %s65_s17 = ssub.s32 %s2667_s12, %s2746_s15 }
  0x14   : > { %p75_p0 = scmp.ne.s32.totalorder %s2663_s11, %s2659_s10  ;;  %p66_p1 = scmp.eq.s32.totalorder %s65_s17, 0 }
  0x15   : > { %p76_p2 = scmp.eq.s32.totalorder %s2667_s12, 0  ;;  %p81_p3 = scmp.ne.s32.totalorder %s2659_s10, %s2655_s30 }
  0x16   : > { %p82_p4 = scmp.eq.s32.totalorder %s2742_s13, 0  ;;  %p225_p7 = scmp.eq.s32.totalorder %s2742_s13, 1 }
  0x17   : > { %s2758_s18 = scalar_select %p66_p1, %s2663_s11, %s68_s16  }
  0x18   : > { %p77_p5 = por %p76_p2, %p75_p0  ;;  %p2760_p6 = por %p82_p4, %p81_p3 }
  0x19   : > { %3666 = sst [smem:[#allocation22_spill]] %s2758_s18  ;;  %p231_p8 = scmp.eq.s32.totalorder %s3650_s14, 1 }
  0x1a   : > { %p2072_p9 = scmp.ge.s32.totalorder %s2667_s12, 2  ;;  %p2371_p10 = scmp.lt.s32.totalorder %s2667_s12, 2 }
  0x1b   : > { %p2769_p11 = por %p225_p7, %p75_p0  ;;  %p2773_p12 = por %p231_p8, %p81_p3 }
  0x1c   : > { %s2778_s22 = sand.u32 1, %s2663_s11   ;;  %s2781_s23 = sshll.u32 %s2667_s12, 3 }
  0x1d   : > { %s3669_s21 = scalar_select %p2773_p12, 1, 0 }
  0x1e   : > { %s2784_s24 = sshll.u32 %s2778_s22, 3  ;;  %p2786_p13 = pnand %p2371_p10, %p77_p5 }
  0x1f   : > { %3670 = sst [smem:[#allocation23_spill]] %s3669_s21  ;;  %s335_s26 = sand.u32 1, %s2667_s12  }
  0x20   : > { %s3672_s2 = sld [smem:[#allocation24_spill]]  ;;  %s339_s16 = scalar_lea.vmem [#allocation5], %s2784_s24 }
  0x21   : > { %s347_s17 = sshll.u32 %s339_s16, 4  ;;  %p2082_p0 = scmp.ge.s32.totalorder %s2667_s12, 1  ;;  %s348_s17 = int_to_ptr.vmem [resolvable:$true] %s347_s17 }
  0x22   : > { %s2797_s18 = scalar_lea.sflag [#allocation6], %s335_s26  ;;  %p2417_p2 = pneg %p2786_p13 }
  0x26   : > { %s343_s29 = scalar_lea.hbm %s3672_s2, %s2781_s23  ;;  %s2420_s16 = scalar_lea.hbm %s3672_s2, 16 }
  0x27   : > { %s345_s14 = sshll.u32 %s343_s29, 4  ;;  %s346_s14 = int_to_ptr.hbm [resolvable:$true] %s345_s14 }
  0x28   : > { %s2413_s11 = sshra.s32 %s346_s14, 4  ;;  %s2414_s11 = int_to_ptr.hbm [resolvable:$true] %s2413_s11 }
  0x29   : > { %s2415_s15 = scalar_lea.hbm %s2414_s11, 8  ;;  %p2421_p5 = scmp.lt.s32.totalorder %s2414_s11, %s3672_s2 }
  0x2a   : > { %p2416_p1 = scmp.ne.s32.totalorder %s2414_s11, %s2415_s15  ;;  %p2422_p7 = scmp.lt.s32.totalorder %s2420_s16, %s2415_s15 }
  0x2c   : > { %p2418_p3 = pnand %p2417_p2, %p2416_p1  ;;  %p2423_p8 = por %p2422_p7, %p2421_p5 }
  0x2e   : > { %p2419_p4 = pneg %p2418_p3 }
  0x30   : > { %p2424_p10 = pnand %p2423_p8, %p2419_p4 }
  0x32   : > { %2427 = shalt.err (!%p2424_p10)
}
  0x33   : > { %2354 = dma.hbm_to_vmem [thread:$0]  (!%p2786_p13), %s346_s14, 128, %s348_s17, %s2797_s18  }
  0x34   : > { %p391_p1 = scmp.lt.s32.totalorder %s2667_s12, 3  ;;  %s324_s21 = scalar_lea.hbm %s3641_s1, %s2781_s23 }
  0x35   : > { %s326_s15 = sshll.u32 %s324_s21, 4  ;;  %s320_s28 = scalar_lea.vmem [#allocation2], %s2784_s24  ;;  %s327_s15 = int_to_ptr.hbm [resolvable:$true] %s326_s15 }
  0x36   : > { %p2820_p3 = pnand %p2082_p0, %p391_p1  ;;  %s328_s16 = sshll.u32 %s320_s28, 4  ;;  %s329_s16 = int_to_ptr.vmem [resolvable:$true] %s328_s16 }
  0x37   : > { %s317_s29 = scalar_lea.sflag [#allocation3], %s2778_s22  ;;  %s2443_s2 = sshra.s32 %s327_s15, 4  ;;  %s2444_s2 = int_to_ptr.hbm [resolvable:$true] %s2443_s2 }
  0x38   : > { %s2445_s30 = scalar_lea.hbm %s2444_s2, 8  ;;  %s2450_s26 = scalar_lea.hbm %s3641_s1, 16 }
  0x39   : > { %p2446_p4 = scmp.ne.s32.totalorder %s2444_s2, %s2445_s30  ;;  %p2451_p0 = scmp.lt.s32.totalorder %s2444_s2, %s3641_s1 }
  0x3a   : > { %p2452_p8 = scmp.lt.s32.totalorder %s2450_s26, %s2445_s30 }
  0x3b   : > { %p2448_p5 = pnand %p2446_p4, %p2417_p2 }
  0x3c   : > { %p2453_p10 = por %p2452_p8, %p2451_p0 }
  0x3d   : > { %p2449_p7 = pneg %p2448_p5 }
  0x3f   : > { %p2454_p1 = pnand %p2453_p10, %p2449_p7 }
  0x41   : > { %2457 = shalt.err (!%p2454_p1)
}
  0x42   : > { %2351 = dma.hbm_to_vmem [thread:$0]  (!%p2786_p13), %s327_s15, 128, %s329_s16, %s317_s29  }
  0x43   : > { %s362_s9 = scalar_lea.hbm %s3643_s3, %s2781_s23  ;;  %s358_s14 = scalar_lea.vmem [#allocation7], %s2784_s24 }
  0x44   : > { %s366_s17 = sshll.u32 %s358_s14, 4  ;;  %s364_s8 = sshll.u32 %s362_s9, 4  ;;  %s367_s17 = int_to_ptr.vmem [resolvable:$true] %s366_s17  ;;  %s365_s8 = int_to_ptr.hbm [resolvable:$true] %s364_s8 }
  0x45   : > { %s2473_s2 = sshra.s32 %s365_s8, 4  ;;  %s2480_s15 = scalar_lea.hbm %s3643_s3, 16  ;;  %s2474_s2 = int_to_ptr.hbm [resolvable:$true] %s2473_s2 }
  0x46   : > { %s2475_s7 = scalar_lea.hbm %s2474_s2, 8  ;;  %p2481_p0 = scmp.lt.s32.totalorder %s2474_s2, %s3643_s3 }
  0x47   : > { %p2476_p4 = scmp.ne.s32.totalorder %s2474_s2, %s2475_s7  ;;  %p2482_p8 = scmp.lt.s32.totalorder %s2480_s15, %s2475_s7 }
  0x49   : > { %p2478_p5 = pnand %p2476_p4, %p2417_p2  ;;  %p2483_p10 = por %p2482_p8, %p2481_p0 }
  0x4b   : > { %p2479_p7 = pneg %p2478_p5 }
  0x4d   : > { %p2484_p1 = pnand %p2483_p10, %p2479_p7 }
  0x4f   : > { %2487 = shalt.err (!%p2484_p1)
}
  0x50   : > { %2357 = dma.hbm_to_vmem [thread:$0]  (!%p2786_p13), %s365_s8, 128, %s367_s17, %s2797_s18  }
  0x51   : > { %s2079_s9 = sshll.u32 %s2778_s22, 6  ;;  %s2300_s23 = sshll.u32 %s2667_s12, 6 }
  0x52   : > { %s382_s21 = scalar_lea.hbm %s3644_s4, %s2300_s23  ;;  %s377_s14 = scalar_lea.vmem [#allocation8], %s2079_s9 }
  0x53   : > { %s384_s28 = sshll.u32 %s382_s21, 4  ;;  %s386_s2 = sshll.u32 %s377_s14, 4  ;;  %s385_s28 = int_to_ptr.hbm [resolvable:$true] %s384_s28  ;;  %s387_s2 = int_to_ptr.vmem [resolvable:$true] %s386_s2 }
  0x54   : > { %s374_s7 = scalar_lea.sflag [#allocation9], %s2778_s22  ;;  %s2503_s30 = sshra.s32 %s385_s28, 4  ;;  %s2504_s30 = int_to_ptr.hbm [resolvable:$true] %s2503_s30 }
  0x55   : > { %s2505_s26 = scalar_lea.hbm %s2504_s30, 64  ;;  %s2510_s17 = scalar_lea.hbm %s3644_s4, 128 }
  0x56   : > { %p2506_p4 = scmp.ne.s32.totalorder %s2504_s30, %s2505_s26  ;;  %p2511_p0 = scmp.lt.s32.totalorder %s2504_s30, %s3644_s4 }
  0x57   : > { %p2512_p8 = scmp.lt.s32.totalorder %s2510_s17, %s2505_s26 }
  0x58   : > { %p2508_p5 = pnand %p2506_p4, %p2417_p2 }
  0x59   : > { %p2513_p10 = por %p2512_p8, %p2511_p0 }
  0x5a   : > { %p2509_p7 = pneg %p2508_p5 }
  0x5c   : > { %p2514_p1 = pnand %p2513_p10, %p2509_p7 }
  0x5e   : > { %2517 = shalt.err (!%p2514_p1)
}
  0x5f   : > { %2360 = dma.hbm_to_vmem [thread:$0]  (!%p2786_p13), %s385_s28, 1024, %s387_s2, %s374_s7  }
  0x60   : > { %395 = sbr.rel (%p2820_p3) target bundleno = 791 (0x317), region = 48  ;;  %s2874_s22 = sand.u32 (!%p2820_p3), 1, %s2659_s10  }
  0x61   : > { %s2877_s29 = sshll.u32 (!%p2820_p3), %s2874_s22, 3  ;;  %s398_s9 = scalar_lea.sflag (!%p2820_p3), [#allocation3], %s2874_s22 }
  0x62   : > { %s401_s23 = scalar_lea.vmem (!%p2820_p3), [#allocation2], %s2877_s29 }
  0x65   : > { %2634 = dma.done.wait (%p2760_p6), %s398_s9, 128  }
  0x66   : > { %2636 = vsyncadd (%p2760_p6), %s398_s9, 4294967168  ;;  %s407_s25 = sand.u32 1, %s2742_s13   ;;  %s411_s24 = scalar_lea.vmem [#allocation5], %s2877_s29 }
  0x67   : > { %s408_s11 = scalar_lea.sflag [#allocation6], %s407_s25 }
  0x68   : > { %2638 = dma.done.wait (%p2760_p6), %s408_s11, 256  }
  0x69   : > { %2640 = vsyncadd (%p2760_p6), %s408_s11, 4294967040  ;;  %s2086_s27 = sshll.u32 %s2874_s22, 6  ;;  %s421_s21 = scalar_lea.vmem [#allocation7], %s2877_s29 }
  0x6a   : > { %s428_s28 = scalar_lea.sflag [#allocation9], %s2874_s22  ;;  %s2898_s14 = scalar_lea.vmem [#allocation8], %s2086_s27 }
  0x6b   : > { %2642 = dma.done.wait (%p2760_p6), %s428_s28, 1024  }
  0x6c   : > { %2644 = vsyncadd (%p2760_p6), %s428_s28, 4294966272  ;;  %v2125_v0 = vld [vmem:[%s3645_s5 + $0x40] sm:$0xf]  ;;  %v2309_v2 = vld [vmem:[%s3645_s5 + $0x44] sm:$0xf]  ;;  %vm558_vm1 = vcmask 261120  }
  0x6d   : > { %v2313_v1 = vld [vmem:[%s3645_s5 + $0x5c] sm:$0xf0]  ;;  %v2127_v4 = vld [vmem:[%s3645_s5 + $0x60] sm:$0xf0]  ;;  %v2133_v5 = vld [vmem:[%s3645_s5 + $0x48] sm:$0xf] }
  0x6e   : > { %v2913_v3 = vor.u32 %v2313_v1, %v2125_v0  ;;  %v2314_v6 = vld [vmem:[%s3645_s5 + $0x64] sm:$0xf0]  ;;  %v2924_v7 = vor.u32 %v2309_v2, %v2127_v4  ;;  %v2310_v9 = vld [vmem:[%s3645_s5 + $0x4c] sm:$0xf]  ;;  %v2093_v11 = vld [vmem:[%s3645_s5] sm:$0xf] }
  0x6f   : > { %v2926_v8 = vor.u32 %v2314_v6, %v2133_v5  ;;  %v2135_v10 = vld [vmem:[%s3645_s5 + $0x68] sm:$0xf0]  ;;  %v2305_v13 = vld [vmem:[%s3645_s5 + $0x1c] sm:$0xf0]  ;;  %v2301_v14 = vld [vmem:[%s3645_s5 + $0x4] sm:$0xf] }
  0x70   : > { %656 = vmatpush.bf16.msra.mxu0 %v2913_v3  ;;  %v2938_v12 = vor.u32 %v2310_v9, %v2135_v10  ;;  %v2095_v15 = vld [vmem:[%s3645_s5 + $0x20] sm:$0xf0]  ;;  %669 = vmatpush.bf16.msra.mxu1 %v2924_v7  ;;  %v2951_v16 = vor.u32 %v2305_v13, %v2093_v11  ;;  %v2101_v18 = vld [vmem:[%s3645_s5 + $0x8] sm:$0xf]  ;;  %v2302_v20 = vld [vmem:[%s3645_s5 + $0xc] sm:$0xf] }
  0x71   : > { %682 = vmatpush.bf16.msra.mxu2 %v2926_v8  ;;  %v2953_v17 = vor.u32 %v2301_v14, %v2095_v15  ;;  %v2306_v19 = vld [vmem:[%s3645_s5 + $0x24] sm:$0xf0]  ;;  %v2103_v22 = vld [vmem:[%s3645_s5 + $0x28] sm:$0xf0]  ;;  %v2149_v24 = vld [vmem:[%s3645_s5 + $0x58] sm:$0xf] }
  0x72   : > { %695 = vmatpush.bf16.msra.mxu3 %v2938_v12  ;;  %v2965_v21 = vor.u32 %v2306_v19, %v2101_v18  ;;  %v502_v23 = vld [vmem:[%s401_s23] sm:$0xff]  ;;  %v2975_v25 = vor.u32 %v2302_v20, %v2103_v22  ;;  %v2316_v27 = vld [vmem:[%s3645_s5 + $0x74] sm:$0xf0]  ;;  %v2312_v29 = vld [vmem:[%s3645_s5 + $0x5c] sm:$0xf]  ;;  %p496_p6 = scmp.lt.s32.totalorder %s2742_s13, 1 }
  0x73   : > { %v553_v26 = vmin.f32 %v502_v23, 0.0  ;;  %v2981_v28 = vor.u32 %v2316_v27, %v2149_v24  ;;  %v2151_v30 = vld [vmem:[%s3645_s5 + $0x78] sm:$0xf0]  ;;  %v2141_v31 = vld [vmem:[%s3645_s5 + $0x50] sm:$0xf]  ;;  %v552_v51 = vadd.f32 1.0, %v502_v23 }
  0x74   : > { %657 = vmatpush.bf16.msra.mxu0 %v2951_v16  ;;  %670 = vmatpush.bf16.msra.mxu1 %v2953_v17  ;;  %v2994_v33 = vor.u32 %v2312_v29, %v2151_v30  ;;  %v2315_v34 = vld [vmem:[%s3645_s5 + $0x6c] sm:$0xf0]  ;;  %v2311_v35 = vld [vmem:[%s3645_s5 + $0x54] sm:$0xf]  ;;  %v2117_v38 = vld [vmem:[%s3645_s5 + $0x18] sm:$0xf] }
  0x75   : > { %683 = vmatpush.bf16.msra.mxu2 %v2965_v21  ;;  %v554_v32 = vmul.f32 1.442695, %v553_v26  ;;  %v3004_v36 = vor.u32 %v2315_v34, %v2141_v31  ;;  %v2143_v37 = vld [vmem:[%s3645_s5 + $0x70] sm:$0xf0]  ;;  %v2308_v39 = vld [vmem:[%s3645_s5 + $0x34] sm:$0xf0] }
  0x76   : > { %696 = vmatpush.bf16.msra.mxu3 %v2975_v25  ;;  %v3016_v40 = vor.u32 %v2311_v35, %v2143_v37  ;;  %v3018_v41 = vor.u32 %v2308_v39, %v2117_v38  ;;  %v2304_v42 = vld [vmem:[%s3645_s5 + $0x1c] sm:$0xf]  ;;  %v2109_v44 = vld [vmem:[%s3645_s5 + $0x10] sm:$0xf]  ;;  %v2303_v47 = vld [vmem:[%s3645_s5 + $0x14] sm:$0xf] }
  0x77   : > { %2407 = vpow2.f32 %v554_v32  ;;  %v2119_v43 = vld [vmem:[%s3645_s5 + $0x38] sm:$0xf0]  ;;  %v2307_v46 = vld [vmem:[%s3645_s5 + $0x2c] sm:$0xf0]  ;;  %v2111_v48 = vld [vmem:[%s3645_s5 + $0x30] sm:$0xf0] }
  0x78   : > { %708 = vmatpush.bf16.msrb.mxu0 %v3004_v36  ;;  %v3030_v45 = vor.u32 %v2304_v42, %v2119_v43  ;;  %721 = vmatpush.bf16.msrb.mxu1 %v3016_v40  ;;  %v3042_v49 = vor.u32 %v2307_v46, %v2109_v44  ;;  %v3044_v50 = vor.u32 %v2303_v47, %v2111_v48  ;;  %vm551_vm0 = vcmp.gt.f32.partialorder %v502_v23, 0.0  ;;  %v2221_v60 = vld [vmem:[%s3646_s6 + $0x48] sm:$0xf]  ;;  %v2326_v62 = vld [vmem:[%s3646_s6 + $0x4c] sm:$0xf]  ;;  %v3205_v42 = vld [vmem:[%s411_s24] sm:$0xff] }
  0x79   : > { %734 = vmatpush.bf16.msrb.mxu2 %v2981_v28  ;;  %v2330_v61 = vld [vmem:[%s3646_s6 + $0x64] sm:$0xf0]  ;;  %v2223_v63 = vld [vmem:[%s3646_s6 + $0x68] sm:$0xf0]  ;;  %v2213_v0 = vld [vmem:[%s3646_s6 + $0x40] sm:$0xf] }
  0x7a   : > { %747 = vmatpush.bf16.msrb.mxu3 %v2994_v33  ;;  %v2329_v2 = vld [vmem:[%s3646_s6 + $0x5c] sm:$0xf0]  ;;  %v2325_v4 = vld [vmem:[%s3646_s6 + $0x44] sm:$0xf]  ;;  %v3127_v6 = vor.u32 %v2330_v61, %v2221_v60  ;;  %v3129_v9 = vor.u32 %v2326_v62, %v2223_v63  ;;  %v2189_v10 = vld [vmem:[%s3646_s6 + $0x8] sm:$0xf] }
  0x7b   : > { %v2215_v5 = vld [vmem:[%s3646_s6 + $0x60] sm:$0xf0]  ;;  %v2322_v11 = vld [vmem:[%s3646_s6 + $0x24] sm:$0xf0]  ;;  %v3137_v13 = vor.u32 %v2329_v2, %v2213_v0  ;;  %v2318_v15 = vld [vmem:[%s3646_s6 + $0xc] sm:$0xf] }
  0x7c   : > { %709 = vmatpush.bf16.msrb.mxu0 %v3042_v49  ;;  %722 = vmatpush.bf16.msrb.mxu1 %v3044_v50  ;;  %v3139_v14 = vor.u32 %v2325_v4, %v2215_v5  ;;  %v2191_v18 = vld [vmem:[%s3646_s6 + $0x28] sm:$0xf0]  ;;  %v2181_v19 = vld [vmem:[%s3646_s6] sm:$0xf]  ;;  %v2317_v22 = vld [vmem:[%s3646_s6 + $0x4] sm:$0xf]  ;;  %v3165_v24 = vor.u32 %v2322_v11, %v2189_v10 }
  0x7d   : > { %735 = vmatpush.bf16.msrb.mxu2 %v3018_v41  ;;  %v2408_v52 = vpop.eup %2407  ;;  %v2321_v20 = vld [vmem:[%s3646_s6 + $0x1c] sm:$0xf0]  ;;  %v2183_v23 = vld [vmem:[%s3646_s6 + $0x20] sm:$0xf0]  ;;  %v3167_v26 = vor.u32 %v2318_v15, %v2191_v18  ;;  %v2237_v30 = vld [vmem:[%s3646_s6 + $0x58] sm:$0xf] }
  0x7e   : > { %748 = vmatpush.bf16.msrb.mxu3 %v3030_v45  ;;  %v3050_v53 = vsel %vm551_vm0, %v552_v51, %v2408_v52  ;;  %v3171_v27 = vor.u32 %v2321_v20, %v2181_v19  ;;  %v3173_v29 = vor.u32 %v2317_v22, %v2183_v23  ;;  %v2332_v31 = vld [vmem:[%s3646_s6 + $0x74] sm:$0xf0]  ;;  %v2328_v32 = vld [vmem:[%s3646_s6 + $0x5c] sm:$0xf]  ;;  %v2229_v35 = vld [vmem:[%s3646_s6 + $0x50] sm:$0xf] }
  0x7f   : > { %v560_v54 = vpack.c.bf16 %v3050_v53, %v3050_v53  ;;  %v2239_v34 = vld [vmem:[%s3646_s6 + $0x78] sm:$0xf0]  ;;  %v2331_v37 = vld [vmem:[%s3646_s6 + $0x6c] sm:$0xf0]  ;;  %v2327_v38 = vld [vmem:[%s3646_s6 + $0x54] sm:$0xf]  ;;  %v3207_v43 = vor.u32 %v2332_v31, %v2237_v30 }
  0x80   : > { %v2231_v39 = vld [vmem:[%s3646_s6 + $0x70] sm:$0xf0]  ;;  %v3209_v44 = vor.u32 %v2328_v32, %v2239_v34  ;;  %v2205_v46 = vld [vmem:[%s3646_s6 + $0x18] sm:$0xf]  ;;  %v3217_v48 = vor.u32 %v2331_v37, %v2229_v35  ;;  %v2320_v52 = vld [vmem:[%s3646_s6 + $0x1c] sm:$0xf] }
  0x81   : > { %v561_v55 = vunpack.c.l.bf16 %v560_v54  ;;  %v2324_v47 = vld [vmem:[%s3646_s6 + $0x34] sm:$0xf0]  ;;  %v3219_v51 = vor.u32 %v2327_v38, %v2231_v39  ;;  %s497_s26 = scalar_select %p496_p6, %s2742_s13, 1 }
  0x82   : > { %v3249_v60 = vor.u32 %v2324_v47, %v2205_v46  ;;  %s3502_s24 = scalar_lea.vmem [#allocation13], %s2086_s27  ;;  %s2669_s27 = smov 64  }
  0x83   : > { %v562_v56 = vsub.f32 %v3050_v53, %v561_v55  ;;  %v2197_v55 = vld [vmem:[%s3646_s6 + $0x10] sm:$0xf]  ;;  %s2090_s8 = sshll.u32 %s497_s26, 3  ;;  %s488_s19 = scalar_lea.vmem [#allocation11], %s2877_s29 }
  0x84   : > { %s499_s15 = scalar_lea.vmem %s3640_s0, %s2090_s8  ;;  %s3674_s11 = sld [smem:[#allocation26_spill]] }
  0x85   : > { %v563_v57 = vpack.c.bf16 %v562_v56, %v562_v56  ;;  %s1841_s2 = sshll.u32 %s488_s19, 4  ;;  %s3572_s7 = scalar_lea.sflag [#allocation12], %s407_s25  ;;  %s1842_s2 = int_to_ptr.vmem [resolvable:$true] %s1841_s2 }
  0x87   : > { %2155 = vmatmul.msk.bf16.vlgmr.msra.gmra.mxu0 %vm558_vm1, %v563_v57  ;;  %2156 = vmatmul.msk.bf16.vlgmr.msra.gmra.mxu1 %vm558_vm1, %v563_v57  ;;  %v564_v58 = vunpack.c.l.bf16 %v563_v57 }
  0x88   : > { %2157 = vmatmul.msk.bf16.vlgmr.msra.gmra.mxu2 %vm558_vm1, %v563_v57  ;;  %2158 = vmatmul.msk.bf16.vlgmr.msra.gmra.mxu3 %vm558_vm1, %v563_v57 }
  0x89   : > { %789 = vmatpush.bf16.msra.mxu2 %v2926_v8  ;;  %802 = vmatpush.bf16.msra.mxu3 %v2938_v12  ;;  %v565_v59 = vsub.f32 %v562_v56, %v564_v58  ;;  %v3234_v56 = vpack.c.bf16 %v3205_v42, %v3205_v42  ;;  %v2319_v58 = vld [vmem:[%s3646_s6 + $0x14] sm:$0xf] }
  0x8a   : > { %763 = vmatpush.bf16.msra.mxu0 %v2913_v3  ;;  %776 = vmatpush.bf16.msra.mxu1 %v2924_v7  ;;  %s3675_s23 = smov %s3674_s11 }
  0x8b   : > { %v566_v1 = vpack.c.bf16 %v565_v59, %v565_v59  ;;  %v2199_v59 = vld [vmem:[%s3646_s6 + $0x30] sm:$0xf0]  ;;  %v977_v0 = vunpack.c.l.bf16 %v3234_v56  ;;  %s2553_s17 = scalar_lea.hbm %s3675_s23, 16 }
  0x8c   : > { %v3257_v63 = vor.u32 %v2319_v58, %v2199_v59 }
  0x8d   : > { %790 = vmatpush.bf16.msra.mxu2 %v2965_v21  ;;  %803 = vmatpush.bf16.msra.mxu3 %v2975_v25 }
  0x8e   : > { %764 = vmatpush.bf16.msra.mxu0 %v2951_v16  ;;  %777 = vmatpush.bf16.msra.mxu1 %v2953_v17 }
  0x97   : > { %2159 = vmatmul.msk.bf16.vlgmr.msrb.gmra.mxu0 %vm558_vm1, %v563_v57  ;;  %2160 = vmatmul.msk.bf16.vlgmr.msrb.gmra.mxu1 %vm558_vm1, %v563_v57 }
  0x98   : > { %2161 = vmatmul.msk.bf16.vlgmr.msrb.gmra.mxu2 %vm558_vm1, %v563_v57  ;;  %2162 = vmatmul.msk.bf16.vlgmr.msrb.gmra.mxu3 %vm558_vm1, %v563_v57  ;;  %v2323_v57 = vld [vmem:[%s3646_s6 + $0x2c] sm:$0xf0] }
  0x99   : > { %841 = vmatpush.bf16.msrb.mxu2 %v2981_v28  ;;  %854 = vmatpush.bf16.msrb.mxu3 %v2994_v33  ;;  %v3255_v62 = vor.u32 %v2323_v57, %v2197_v55 }
  0x9a   : > { %815 = vmatpush.bf16.msrb.mxu0 %v3004_v36  ;;  %828 = vmatpush.bf16.msrb.mxu1 %v3016_v40 }
  0x9d   : > { %842 = vmatpush.bf16.msrb.mxu2 %v3018_v41  ;;  %855 = vmatpush.bf16.msrb.mxu3 %v3030_v45 }
  0x9e   : > { %816 = vmatpush.bf16.msrb.mxu0 %v3042_v49  ;;  %829 = vmatpush.bf16.msrb.mxu1 %v3044_v50 }
  0xa7   : > { %2163 = vmatmul.msk.bf16.vlgmr.msra.gmra.mxu0 %vm558_vm1, %v560_v54  ;;  %2164 = vmatmul.msk.bf16.vlgmr.msra.gmra.mxu1 %vm558_vm1, %v560_v54 }
  0xa8   : > { %2165 = vmatmul.msk.bf16.vlgmr.msra.gmra.mxu2 %vm558_vm1, %v560_v54  ;;  %2166 = vmatmul.msk.bf16.vlgmr.msra.gmra.mxu3 %vm558_vm1, %v560_v54 }
  0xa9   : > { %896 = vmatpush.bf16.msra.mxu2 %v2926_v8  ;;  %909 = vmatpush.bf16.msra.mxu3 %v2938_v12 }
  0xaa   : > { %870 = vmatpush.bf16.msra.mxu0 %v2913_v3  ;;  %883 = vmatpush.bf16.msra.mxu1 %v2924_v7 }
  0xad   : > { %897 = vmatpush.bf16.msra.mxu2 %v2965_v21  ;;  %910 = vmatpush.bf16.msra.mxu3 %v2975_v25 }
  0xae   : > { %871 = vmatpush.bf16.msra.mxu0 %v2951_v16  ;;  %884 = vmatpush.bf16.msra.mxu1 %v2953_v17 }
  0xb7   : > { %2167 = vmatmul.msk.bf16.vlgmr.msrb.gmra.mxu0 %vm558_vm1, %v560_v54  ;;  %2168 = vmatmul.msk.bf16.vlgmr.msrb.gmra.mxu1 %vm558_vm1, %v560_v54 }
  0xb8   : > { %2169 = vmatmul.msk.bf16.vlgmr.msrb.gmra.mxu2 %vm558_vm1, %v560_v54  ;;  %2170 = vmatmul.msk.bf16.vlgmr.msrb.gmra.mxu3 %vm558_vm1, %v560_v54  ;;  %v2207_v54 = vld [vmem:[%s3646_s6 + $0x38] sm:$0xf0] }
  0xb9   : > { %948 = vmatpush.bf16.msrb.mxu2 %v2981_v28  ;;  %961 = vmatpush.bf16.msrb.mxu3 %v2994_v33  ;;  %v3251_v61 = vor.u32 %v2320_v52, %v2207_v54 }
  0xba   : > { %922 = vmatpush.bf16.msrb.mxu0 %v3004_v36  ;;  %935 = vmatpush.bf16.msrb.mxu1 %v3016_v40 }
  0xbd   : > { %949 = vmatpush.bf16.msrb.mxu2 %v3018_v41  ;;  %962 = vmatpush.bf16.msrb.mxu3 %v3030_v45 }
  0xbe   : > { %923 = vmatpush.bf16.msrb.mxu0 %v3042_v49  ;;  %936 = vmatpush.bf16.msrb.mxu1 %v3044_v50 }
  0xc7   : > { %2171 = vmatmul.msk.bf16.vlgmr.msra.gmra.mxu0 %vm558_vm1, %v566_v1  ;;  %2172 = vmatmul.msk.bf16.vlgmr.msra.gmra.mxu1 %vm558_vm1, %v566_v1 }
  0xc8   : > { %2173 = vmatmul.msk.bf16.vlgmr.msra.gmra.mxu2 %vm558_vm1, %v566_v1  ;;  %2174 = vmatmul.msk.bf16.vlgmr.msra.gmra.mxu3 %vm558_vm1, %v566_v1 }
  0xc9   : > { %1098 = vmatpush.bf16.msra.mxu2 %v3127_v6  ;;  %1111 = vmatpush.bf16.msra.mxu3 %v3129_v9 }
  0xca   : > { %1072 = vmatpush.bf16.msra.mxu0 %v3137_v13  ;;  %1085 = vmatpush.bf16.msra.mxu1 %v3139_v14 }
  0xcd   : > { %1099 = vmatpush.bf16.msra.mxu2 %v3165_v24  ;;  %1112 = vmatpush.bf16.msra.mxu3 %v3167_v26 }
  0xce   : > { %1073 = vmatpush.bf16.msra.mxu0 %v3171_v27  ;;  %1086 = vmatpush.bf16.msra.mxu1 %v3173_v29 }
  0xd7   : > { %2175 = vmatmul.msk.bf16.vlgmr.msrb.gmra.mxu0 %vm558_vm1, %v566_v1  ;;  %2176 = vmatmul.msk.bf16.vlgmr.msrb.gmra.mxu1 %vm558_vm1, %v566_v1 }
  0xd8   : > { %2177 = vmatmul.msk.bf16.vlgmr.msrb.gmra.mxu2 %vm558_vm1, %v566_v1  ;;  %2178 = vmatmul.msk.bf16.vlgmr.msrb.gmra.mxu3 %vm558_vm1, %v566_v1  ;;  %v3265_v1 = vsub.f32 %v3205_v42, %v977_v0 }
  0xd9   : > { %1150 = vmatpush.bf16.msrb.mxu2 %v3207_v43  ;;  %1163 = vmatpush.bf16.msrb.mxu3 %v3209_v44 }
  0xda   : > { %1124 = vmatpush.bf16.msrb.mxu0 %v3217_v48  ;;  %1137 = vmatpush.bf16.msrb.mxu1 %v3219_v51  ;;  %v3269_v2 = vpack.c.bf16 %v3265_v1, %v3265_v1 }
  0xdc   : > { %v980_v22 = vunpack.c.l.bf16 %v3269_v2 }
  0xdd   : > { %1151 = vmatpush.bf16.msrb.mxu2 %v3249_v60  ;;  %1164 = vmatpush.bf16.msrb.mxu3 %v3251_v61 }
  0xde   : > { %1125 = vmatpush.bf16.msrb.mxu0 %v3255_v62  ;;  %1138 = vmatpush.bf16.msrb.mxu1 %v3257_v63 }
  0xe7   : > { %2243 = vmatmul.msk.bf16.vlgmr.msra.gmra.mxu0 %vm558_vm1, %v3269_v2  ;;  %2244 = vmatmul.msk.bf16.vlgmr.msra.gmra.mxu1 %vm558_vm1, %v3269_v2 }
  0xe8   : > { %2245 = vmatmul.msk.bf16.vlgmr.msra.gmra.mxu2 %vm558_vm1, %v3269_v2  ;;  %2246 = vmatmul.msk.bf16.vlgmr.msra.gmra.mxu3 %vm558_vm1, %v3269_v2 }
  0xe9   : > { %1205 = vmatpush.bf16.msra.mxu2 %v3127_v6  ;;  %1218 = vmatpush.bf16.msra.mxu3 %v3129_v9 }
  0xea   : > { %1179 = vmatpush.bf16.msra.mxu0 %v3137_v13  ;;  %1192 = vmatpush.bf16.msra.mxu1 %v3139_v14 }
  0xed   : > { %1206 = vmatpush.bf16.msra.mxu2 %v3165_v24  ;;  %1219 = vmatpush.bf16.msra.mxu3 %v3167_v26 }
  0xee   : > { %1180 = vmatpush.bf16.msra.mxu0 %v3171_v27  ;;  %1193 = vmatpush.bf16.msra.mxu1 %v3173_v29 }
  0xf7   : > { %2247 = vmatmul.msk.bf16.vlgmr.msrb.gmra.mxu0 %vm558_vm1, %v3269_v2  ;;  %2248 = vmatmul.msk.bf16.vlgmr.msrb.gmra.mxu1 %vm558_vm1, %v3269_v2 }
  0xf8   : > { %2249 = vmatmul.msk.bf16.vlgmr.msrb.gmra.mxu2 %vm558_vm1, %v3269_v2  ;;  %2250 = vmatmul.msk.bf16.vlgmr.msrb.gmra.mxu3 %vm558_vm1, %v3269_v2 }
  0xf9   : > { %1257 = vmatpush.bf16.msrb.mxu2 %v3207_v43  ;;  %1270 = vmatpush.bf16.msrb.mxu3 %v3209_v44 }
  0xfa   : > { %1231 = vmatpush.bf16.msrb.mxu0 %v3217_v48  ;;  %1244 = vmatpush.bf16.msrb.mxu1 %v3219_v51 }
  0xfd   : > { %1258 = vmatpush.bf16.msrb.mxu2 %v3249_v60  ;;  %1271 = vmatpush.bf16.msrb.mxu3 %v3251_v61 }
  0xfe   : > { %1232 = vmatpush.bf16.msrb.mxu0 %v3255_v62  ;;  %1245 = vmatpush.bf16.msrb.mxu1 %v3257_v63 }
 0x104   : > { %v659_v4 = vpop.f32.mrf.mxu0  ;;  %v672_v5 = vpop.f32.mrf.mxu1 }
 0x107   : > { %2251 = vmatmul.msk.bf16.vlgmr.msra.gmra.mxu0 %vm558_vm1, %v3234_v56  ;;  %2252 = vmatmul.msk.bf16.vlgmr.msra.gmra.mxu1 %vm558_vm1, %v3234_v56 }
 0x108   : > { %2253 = vmatmul.msk.bf16.vlgmr.msra.gmra.mxu2 %vm558_vm1, %v3234_v56  ;;  %2254 = vmatmul.msk.bf16.vlgmr.msra.gmra.mxu3 %vm558_vm1, %v3234_v56 }
 0x109   : > { %1312 = vmatpush.bf16.msra.mxu2 %v3127_v6  ;;  %1325 = vmatpush.bf16.msra.mxu3 %v3129_v9 }
 0x10a   : > { %1286 = vmatpush.bf16.msra.mxu0 %v3137_v13  ;;  %1299 = vmatpush.bf16.msra.mxu1 %v3139_v14 }
 0x10b   : > { %v685_v10 = vpop.f32.mrf.mxu2  ;;  %v698_v11 = vpop.f32.mrf.mxu3 }
 0x10c   : > { %v661_v15 = vpop.f32.mrf.mxu0  ;;  %v674_v18 = vpop.f32.mrf.mxu1 }
 0x10d   : > { %1313 = vmatpush.bf16.msra.mxu2 %v3165_v24  ;;  %1326 = vmatpush.bf16.msra.mxu3 %v3167_v26  ;;  %v981_v26 = vsub.f32 %v3265_v1, %v980_v22 }
 0x10e   : > { %1287 = vmatpush.bf16.msra.mxu0 %v3171_v27  ;;  %1300 = vmatpush.bf16.msra.mxu1 %v3173_v29  ;;  %v501_v27 = vld [vmem:[%s499_s15] sm:$0xff] }
 0x10f   : > { %v982_v31 = vpack.c.bf16 %v981_v26, %v981_v26  ;;  %v547_v32 = vmin.f32 %v501_v27, 0.0  ;;  %v546_v52 = vadd.f32 1.0, %v501_v27  ;;  %vm545_vm2 = vcmp.gt.f32.partialorder %v501_v27, 0.0 }
 0x111   : > { %v548_v39 = vmul.f32 1.442695, %v547_v32 }
 0x113   : > { %v687_v6 = vpop.f32.mrf.mxu2  ;;  %v700_v9 = vpop.f32.mrf.mxu3  ;;  %2409 = vpow2.f32 %v548_v39 }
 0x114   : > { %v711_v19 = vpop.f32.mrf.mxu0  ;;  %v724_v20 = vpop.f32.mrf.mxu1 }
 0x117   : > { %2255 = vmatmul.msk.bf16.vlgmr.msrb.gmra.mxu0 %vm558_vm1, %v3234_v56  ;;  %2256 = vmatmul.msk.bf16.vlgmr.msrb.gmra.mxu1 %vm558_vm1, %v3234_v56 }
 0x118   : > { %2257 = vmatmul.msk.bf16.vlgmr.msrb.gmra.mxu2 %vm558_vm1, %v3234_v56  ;;  %2258 = vmatmul.msk.bf16.vlgmr.msrb.gmra.mxu3 %vm558_vm1, %v3234_v56 }
 0x119   : > { %1364 = vmatpush.bf16.msrb.mxu2 %v3207_v43  ;;  %1377 = vmatpush.bf16.msrb.mxu3 %v3209_v44  ;;  %v2410_v54 = vpop.eup %2409 }
 0x11a   : > { %1338 = vmatpush.bf16.msrb.mxu0 %v3217_v48  ;;  %1351 = vmatpush.bf16.msrb.mxu1 %v3219_v51  ;;  %v3354_v59 = vsel %vm545_vm2, %v546_v52, %v2410_v54 }
 0x11b   : > { %v737_v13 = vpop.f32.mrf.mxu2  ;;  %v750_v14 = vpop.f32.mrf.mxu3 }
 0x11c   : > { %v713_v23 = vpop.f32.mrf.mxu0  ;;  %v726_v24 = vpop.f32.mrf.mxu1 }
 0x11d   : > { %1365 = vmatpush.bf16.msrb.mxu2 %v3249_v60  ;;  %1378 = vmatpush.bf16.msrb.mxu3 %v3251_v61 }
 0x11e   : > { %1339 = vmatpush.bf16.msrb.mxu0 %v3255_v62  ;;  %1352 = vmatpush.bf16.msrb.mxu1 %v3257_v63  ;;  %v3360_v62 = vpack.c.bf16 %v3354_v59, %v3354_v59 }
 0x120   : > { %v1417_v1 = vunpack.c.l.bf16 %v3360_v62 }
 0x123   : > { %v739_v29 = vpop.f32.mrf.mxu2  ;;  %v752_v30 = vpop.f32.mrf.mxu3 }
 0x124   : > { %v766_v34 = vpop.f32.mrf.mxu0  ;;  %v779_v35 = vpop.f32.mrf.mxu1 }
 0x125   : > { %v767_v37 = vadd.f32 %v766_v34, %v659_v4  ;;  %v780_v38 = vadd.f32 %v779_v35, %v672_v5 }
 0x127   : > { %2259 = vmatmul.msk.bf16.vlgmr.msra.gmra.mxu0 %vm558_vm1, %v982_v31  ;;  %2260 = vmatmul.msk.bf16.vlgmr.msra.gmra.mxu1 %vm558_vm1, %v982_v31 }
 0x128   : > { %2261 = vmatmul.msk.bf16.vlgmr.msra.gmra.mxu2 %vm558_vm1, %v982_v31  ;;  %2262 = vmatmul.msk.bf16.vlgmr.msra.gmra.mxu3 %vm558_vm1, %v982_v31 }
 0x129   : > { %1458 = vmatpush.bf16.msra.mxu2 %v2926_v8  ;;  %1471 = vmatpush.bf16.msra.mxu3 %v2938_v12 }
 0x12a   : > { %1432 = vmatpush.bf16.msra.mxu0 %v2913_v3  ;;  %1445 = vmatpush.bf16.msra.mxu1 %v2924_v7 }
 0x12b   : > { %v792_v43 = vpop.f32.mrf.mxu2  ;;  %v805_v44 = vpop.f32.mrf.mxu3 }
 0x12c   : > { %v793_v46 = vadd.f32 %v792_v43, %v685_v10  ;;  %v806_v47 = vadd.f32 %v805_v44, %v698_v11  ;;  %v768_v48 = vpop.f32.mrf.mxu0  ;;  %v781_v51 = vpop.f32.mrf.mxu1  ;;  %v3374_v11 = vsub.f32 %v3354_v59, %v1417_v1 }
 0x12d   : > { %1459 = vmatpush.bf16.msra.mxu2 %v2965_v21  ;;  %1472 = vmatpush.bf16.msra.mxu3 %v2975_v25 }
 0x12e   : > { %1433 = vmatpush.bf16.msra.mxu0 %v2951_v16  ;;  %1446 = vmatpush.bf16.msra.mxu1 %v2953_v17  ;;  %v3378_v6 = vpack.c.bf16 %v3374_v11, %v3374_v11 }
 0x133   : > { %v794_v55 = vpop.f32.mrf.mxu2  ;;  %v807_v56 = vpop.f32.mrf.mxu3 }
 0x134   : > { %v818_v57 = vpop.f32.mrf.mxu0  ;;  %v831_v58 = vpop.f32.mrf.mxu1 }
 0x135   : > { %v819_v60 = vadd.f32 %v818_v57, %v711_v19  ;;  %v832_v61 = vadd.f32 %v831_v58, %v724_v20 }
 0x137   : > { %2263 = vmatmul.msk.bf16.vlgmr.msrb.gmra.mxu0 %vm558_vm1, %v982_v31  ;;  %2264 = vmatmul.msk.bf16.vlgmr.msrb.gmra.mxu1 %vm558_vm1, %v982_v31 }
 0x138   : > { %2265 = vmatmul.msk.bf16.vlgmr.msrb.gmra.mxu2 %vm558_vm1, %v982_v31  ;;  %2266 = vmatmul.msk.bf16.vlgmr.msrb.gmra.mxu3 %vm558_vm1, %v982_v31 }
 0x139   : > { %1510 = vmatpush.bf16.msrb.mxu2 %v2981_v28  ;;  %1523 = vmatpush.bf16.msrb.mxu3 %v2994_v33 }
 0x13a   : > { %1484 = vmatpush.bf16.msrb.mxu0 %v3004_v36  ;;  %1497 = vmatpush.bf16.msrb.mxu1 %v3016_v40 }
 0x13b   : > { %v844_v63 = vpop.f32.mrf.mxu2  ;;  %v857_v0 = vpop.f32.mrf.mxu3 }
 0x13c   : > { %v845_v2 = vadd.f32 %v844_v63, %v737_v13  ;;  %v858_v4 = vadd.f32 %v857_v0, %v750_v14  ;;  %v820_v5 = vpop.f32.mrf.mxu0  ;;  %v833_v10 = vpop.f32.mrf.mxu1 }
 0x13d   : > { %1511 = vmatpush.bf16.msrb.mxu2 %v3018_v41  ;;  %1524 = vmatpush.bf16.msrb.mxu3 %v3030_v45 }
 0x13e   : > { %1485 = vmatpush.bf16.msrb.mxu0 %v3042_v49  ;;  %1498 = vmatpush.bf16.msrb.mxu1 %v3044_v50 }
 0x143   : > { %v846_v15 = vpop.f32.mrf.mxu2  ;;  %v859_v18 = vpop.f32.mrf.mxu3 }
 0x144   : > { %v873_v9 = vpop.f32.mrf.mxu0  ;;  %v886_v19 = vpop.f32.mrf.mxu1 }
 0x145   : > { %v3380_v20 = vadd.f32 %v873_v9, %v767_v37  ;;  %v3382_v13 = vadd.f32 %v886_v19, %v780_v38 }
 0x147   : > { %2267 = vmatmul.msk.bf16.vlgmr.msra.gmra.mxu0 %vm558_vm1, %v3378_v6  ;;  %2268 = vmatmul.msk.bf16.vlgmr.msra.gmra.mxu1 %vm558_vm1, %v3378_v6 }
 0x148   : > { %2269 = vmatmul.msk.bf16.vlgmr.msra.gmra.mxu2 %vm558_vm1, %v3378_v6  ;;  %2270 = vmatmul.msk.bf16.vlgmr.msra.gmra.mxu3 %vm558_vm1, %v3378_v6 }
 0x149   : > { %1565 = vmatpush.bf16.msra.mxu2 %v2926_v8  ;;  %1578 = vmatpush.bf16.msra.mxu3 %v2938_v12 }
 0x14a   : > { %1539 = vmatpush.bf16.msra.mxu0 %v2913_v3  ;;  %1552 = vmatpush.bf16.msra.mxu1 %v2924_v7 }
 0x14b   : > { %v899_v14 = vpop.f32.mrf.mxu2  ;;  %v912_v22 = vpop.f32.mrf.mxu3 }
 0x14c   : > { %v3396_v23 = vadd.f32 %v899_v14, %v793_v46  ;;  %v3398_v24 = vadd.f32 %v912_v22, %v806_v47  ;;  %v875_v26 = vpop.f32.mrf.mxu0  ;;  %v888_v27 = vpop.f32.mrf.mxu1 }
 0x14d   : > { %1566 = vmatpush.bf16.msra.mxu2 %v2965_v21  ;;  %1579 = vmatpush.bf16.msra.mxu3 %v2975_v25  ;;  %v3489_v26 = vld [vmem:[%s2898_s14] sm:$0xff]  ;;  %v3492_v27 = vld [vmem:[%s2898_s14 + $0x8] sm:$0xff] }
 0x14e   : > { %1540 = vmatpush.bf16.msra.mxu0 %v2951_v16  ;;  %1553 = vmatpush.bf16.msra.mxu1 %v2953_v17 }
 0x153   : > { %v901_v29 = vpop.f32.mrf.mxu2  ;;  %v914_v30 = vpop.f32.mrf.mxu3 }
 0x154   : > { %v925_v31 = vpop.f32.mrf.mxu0  ;;  %v938_v32 = vpop.f32.mrf.mxu1 }
 0x155   : > { %v3404_v34 = vadd.f32 %v925_v31, %v819_v60  ;;  %v3406_v35 = vadd.f32 %v938_v32, %v832_v61 }
 0x157   : > { %2271 = vmatmul.msk.bf16.vlgmr.msrb.gmra.mxu0 %vm558_vm1, %v3378_v6  ;;  %2272 = vmatmul.msk.bf16.vlgmr.msrb.gmra.mxu1 %vm558_vm1, %v3378_v6 }
 0x158   : > { %2273 = vmatmul.msk.bf16.vlgmr.msrb.gmra.mxu2 %vm558_vm1, %v3378_v6  ;;  %2274 = vmatmul.msk.bf16.vlgmr.msrb.gmra.mxu3 %vm558_vm1, %v3378_v6 }
 0x159   : > { %1617 = vmatpush.bf16.msrb.mxu2 %v2981_v28  ;;  %1630 = vmatpush.bf16.msrb.mxu3 %v2994_v33 }
 0x15a   : > { %1591 = vmatpush.bf16.msrb.mxu0 %v3004_v36  ;;  %1604 = vmatpush.bf16.msrb.mxu1 %v3016_v40 }
 0x15b   : > { %v951_v37 = vpop.f32.mrf.mxu2  ;;  %v964_v38 = vpop.f32.mrf.mxu3 }
 0x15c   : > { %v3420_v39 = vadd.f32 %v951_v37, %v845_v2  ;;  %v3422_v43 = vadd.f32 %v964_v38, %v858_v4  ;;  %v927_v44 = vpop.f32.mrf.mxu0  ;;  %v940_v46 = vpop.f32.mrf.mxu1 }
 0x15d   : > { %1618 = vmatpush.bf16.msrb.mxu2 %v3018_v41  ;;  %1631 = vmatpush.bf16.msrb.mxu3 %v3030_v45 }
 0x15e   : > { %1592 = vmatpush.bf16.msrb.mxu0 %v3042_v49  ;;  %1605 = vmatpush.bf16.msrb.mxu1 %v3044_v50 }
 0x163   : > { %v953_v47 = vpop.f32.mrf.mxu2  ;;  %v966_v48 = vpop.f32.mrf.mxu3 }
 0x164   : > { %v3428_v51 = vpop.f32.mrf.mxu0  ;;  %v3430_v52 = vpop.f32.mrf.mxu1 }
 0x167   : > { %2275 = vmatmul.msk.bf16.vlgmr.msra.gmra.mxu0 %vm558_vm1, %v3360_v62  ;;  %2276 = vmatmul.msk.bf16.vlgmr.msra.gmra.mxu1 %vm558_vm1, %v3360_v62 }
 0x168   : > { %2277 = vmatmul.msk.bf16.vlgmr.msra.gmra.mxu2 %vm558_vm1, %v3360_v62  ;;  %2278 = vmatmul.msk.bf16.vlgmr.msra.gmra.mxu3 %vm558_vm1, %v3360_v62 }
 0x169   : > { %1672 = vmatpush.bf16.msra.mxu2 %v2926_v8  ;;  %1685 = vmatpush.bf16.msra.mxu3 %v2938_v12 }
 0x16a   : > { %1646 = vmatpush.bf16.msra.mxu0 %v2913_v3  ;;  %1659 = vmatpush.bf16.msra.mxu1 %v2924_v7 }
 0x16b   : > { %v3444_v54 = vpop.f32.mrf.mxu2  ;;  %v3446_v55 = vpop.f32.mrf.mxu3 }
 0x16c   : > { %v1077_v56 = vpop.f32.mrf.mxu0  ;;  %v1090_v57 = vpop.f32.mrf.mxu1 }
 0x16d   : > { %1673 = vmatpush.bf16.msra.mxu2 %v2965_v21  ;;  %1686 = vmatpush.bf16.msra.mxu3 %v2975_v25 }
 0x16e   : > { %1647 = vmatpush.bf16.msra.mxu0 %v2951_v16  ;;  %1660 = vmatpush.bf16.msra.mxu1 %v2953_v17  ;;  %v1420_v17 = vunpack.c.l.bf16 %v3378_v6 }
 0x173   : > { %v1103_v8 = vpop.f32.mrf.mxu2  ;;  %v1116_v12 = vpop.f32.mrf.mxu3 }
 0x174   : > { %v3452_v58 = vpop.f32.mrf.mxu0  ;;  %v3454_v3 = vpop.f32.mrf.mxu1 }
 0x177   : > { %2279 = vmatmul.msk.bf16.vlgmr.msrb.gmra.mxu0 %vm558_vm1, %v3360_v62  ;;  %2280 = vmatmul.msk.bf16.vlgmr.msrb.gmra.mxu1 %vm558_vm1, %v3360_v62 }
 0x178   : > { %2281 = vmatmul.msk.bf16.vlgmr.msrb.gmra.mxu2 %vm558_vm1, %v3360_v62  ;;  %2282 = vmatmul.msk.bf16.vlgmr.msrb.gmra.mxu3 %vm558_vm1, %v3360_v62 }
 0x179   : > { %1724 = vmatpush.bf16.msrb.mxu2 %v2981_v28  ;;  %1737 = vmatpush.bf16.msrb.mxu3 %v2994_v33  ;;  %v1421_v28 = vsub.f32 %v3374_v11, %v1420_v17 }
 0x17a   : > { %1698 = vmatpush.bf16.msrb.mxu0 %v3004_v36  ;;  %1711 = vmatpush.bf16.msrb.mxu1 %v3016_v40 }
 0x17b   : > { %v3468_v7 = vpop.f32.mrf.mxu2  ;;  %v3470_v16 = vpop.f32.mrf.mxu3  ;;  %v1422_v40 = vpack.c.bf16 %v1421_v28, %v1421_v28 }
 0x17c   : > { %v1129_v21 = vpop.f32.mrf.mxu0  ;;  %v1142_v25 = vpop.f32.mrf.mxu1 }
 0x17d   : > { %1725 = vmatpush.bf16.msrb.mxu2 %v3018_v41  ;;  %1738 = vmatpush.bf16.msrb.mxu3 %v3030_v45 }
 0x17e   : > { %1699 = vmatpush.bf16.msrb.mxu0 %v3042_v49  ;;  %1712 = vmatpush.bf16.msrb.mxu1 %v3044_v50 }
 0x183   : > { %v1155_v33 = vpop.f32.mrf.mxu2  ;;  %v1168_v36 = vpop.f32.mrf.mxu3 }
 0x184   : > { %v1182_v60 = vpop.f32.mrf.mxu0  ;;  %v1195_v61 = vpop.f32.mrf.mxu1 }
 0x185   : > { %v1183_v11 = vadd.f32 %v1182_v60, %v3428_v51  ;;  %v1196_v15 = vadd.f32 %v1195_v61, %v3430_v52  ;;  %v3507_v51 = vld [vmem:[%s2898_s14 + $0x10] sm:$0xff]  ;;  %v3510_v52 = vld [vmem:[%s2898_s14 + $0x18] sm:$0xff] }
 0x187   : > { %2283 = vmatmul.msk.bf16.vlgmr.msra.gmra.mxu0 %vm558_vm1, %v1422_v40  ;;  %2284 = vmatmul.msk.bf16.vlgmr.msra.gmra.mxu1 %vm558_vm1, %v1422_v40 }
 0x188   : > { %2285 = vmatmul.msk.bf16.vlgmr.msra.gmra.mxu2 %vm558_vm1, %v1422_v40  ;;  %2286 = vmatmul.msk.bf16.vlgmr.msra.gmra.mxu3 %vm558_vm1, %v1422_v40 }
 0x18b   : > { %v1208_v41 = vpop.f32.mrf.mxu2  ;;  %v1221_v45 = vpop.f32.mrf.mxu3 }
 0x18c   : > { %v1184_v49 = vpop.f32.mrf.mxu0  ;;  %v1197_v62 = vpop.f32.mrf.mxu1  ;;  %v1209_v37 = vadd.f32 %v1208_v41, %v3444_v54  ;;  %v1222_v38 = vadd.f32 %v1221_v45, %v3446_v55 }
 0x193   : > { %v1210_v50 = vpop.f32.mrf.mxu2  ;;  %v1223_v63 = vpop.f32.mrf.mxu3 }
 0x194   : > { %v1234_v0 = vpop.f32.mrf.mxu0  ;;  %v1247_v1 = vpop.f32.mrf.mxu1 }
 0x195   : > { %v1235_v8 = vadd.f32 %v1234_v0, %v3452_v58  ;;  %v1248_v12 = vadd.f32 %v1247_v1, %v3454_v3 }
 0x197   : > { %2287 = vmatmul.msk.bf16.vlgmr.msrb.gmra.mxu0 %vm558_vm1, %v1422_v40  ;;  %2288 = vmatmul.msk.bf16.vlgmr.msrb.gmra.mxu1 %vm558_vm1, %v1422_v40 }
 0x198   : > { %2289 = vmatmul.msk.bf16.vlgmr.msrb.gmra.mxu2 %vm558_vm1, %v1422_v40  ;;  %2290 = vmatmul.msk.bf16.vlgmr.msrb.gmra.mxu3 %vm558_vm1, %v1422_v40 }
 0x19b   : > { %v1260_v2 = vpop.f32.mrf.mxu2  ;;  %v1273_v4 = vpop.f32.mrf.mxu3 }
 0x19c   : > { %v1236_v5 = vpop.f32.mrf.mxu0  ;;  %v1249_v10 = vpop.f32.mrf.mxu1  ;;  %v1261_v61 = vadd.f32 %v1260_v2, %v3468_v7  ;;  %v1274_v41 = vadd.f32 %v1273_v4, %v3470_v16 }
 0x1a3   : > { %v1262_v18 = vpop.f32.mrf.mxu2  ;;  %v1275_v6 = vpop.f32.mrf.mxu3 }
 0x1a4   : > { %v1289_v9 = vpop.f32.mrf.mxu0  ;;  %v1302_v19 = vpop.f32.mrf.mxu1 }
 0x1a5   : > { %v1384_v14 = vadd.f32 %v1289_v9, %v1183_v11  ;;  %v1385_v22 = vadd.f32 %v1302_v19, %v1196_v15 }
 0x1a7   : > { %v1392_v29 = vmul.f32 %v1384_v14, %v3380_v20  ;;  %v1393_v30 = vmul.f32 %v1385_v22, %v3382_v13 }
 0x1a9   : > { %v1400_v31 = vadd.f32 %v1392_v29, %v3489_v26  ;;  %v1401_v32 = vadd.f32 %v1393_v30, %v3492_v27 }
 0x1ab   : > { %v1315_v44 = vpop.f32.mrf.mxu2  ;;  %v1328_v46 = vpop.f32.mrf.mxu3  ;;  %1408 = vst [vmem:[%s3502_s24] sm:$0xff] %v1400_v31 }
 0x1ac   : > { %v1386_v20 = vadd.f32 %v1315_v44, %v1209_v37  ;;  %v1387_v13 = vadd.f32 %v1328_v46, %v1222_v38  ;;  %v1291_v47 = vpop.f32.mrf.mxu0  ;;  %v1304_v48 = vpop.f32.mrf.mxu1  ;;  %1409 = vst [vmem:[%s3502_s24 + $0x8] sm:$0xff] %v1401_v32 }
 0x1ae   : > { %v1394_v54 = vmul.f32 %v1386_v20, %v3396_v23  ;;  %v1395_v55 = vmul.f32 %v1387_v13, %v3398_v24  ;;  %v3521_v23 = vld [vmem:[%s2898_s14 + $0x20] sm:$0xff]  ;;  %v3524_v24 = vld [vmem:[%s2898_s14 + $0x28] sm:$0xff] }
 0x1b0   : > { %v1402_v56 = vadd.f32 %v1394_v54, %v3507_v51  ;;  %v1403_v57 = vadd.f32 %v1395_v55, %v3510_v52 }
 0x1b2   : > { %1410 = vst [vmem:[%s3502_s24 + $0x10] sm:$0xff] %v1402_v56 }
 0x1b3   : > { %v1317_v17 = vpop.f32.mrf.mxu2  ;;  %v1330_v21 = vpop.f32.mrf.mxu3  ;;  %1411 = vst [vmem:[%s3502_s24 + $0x18] sm:$0xff] %v1403_v57 }
 0x1b4   : > { %v1341_v25 = vpop.f32.mrf.mxu0  ;;  %v1354_v28 = vpop.f32.mrf.mxu1 }
 0x1b5   : > { %v1388_v33 = vadd.f32 %v1341_v25, %v1235_v8  ;;  %v1389_v36 = vadd.f32 %v1354_v28, %v1248_v12 }
 0x1b7   : > { %v1396_v40 = vmul.f32 %v1388_v33, %v3404_v34  ;;  %v1397_v58 = vmul.f32 %v1389_v36, %v3406_v35  ;;  %v3535_v34 = vld [vmem:[%s2898_s14 + $0x30] sm:$0xff]  ;;  %v3538_v35 = vld [vmem:[%s2898_s14 + $0x38] sm:$0xff]  ;;  %s2294_s14 = sshll.u32 %s2742_s13, 3 }
 0x1b8   : > { %s1839_s28 = scalar_lea.hbm %s3674_s11, %s2294_s14 }
 0x1b9   : > { %v1404_v3 = vadd.f32 %v1396_v40, %v3521_v23  ;;  %v1405_v60 = vadd.f32 %v1397_v58, %v3524_v24 }
 0x1bb   : > { %v1367_v45 = vpop.f32.mrf.mxu2  ;;  %v1380_v49 = vpop.f32.mrf.mxu3  ;;  %1412 = vst [vmem:[%s3502_s24 + $0x20] sm:$0xff] %v1404_v3 }
 0x1bc   : > { %v1390_v62 = vadd.f32 %v1367_v45, %v1261_v61  ;;  %v1391_v50 = vadd.f32 %v1380_v49, %v1274_v41  ;;  %v1343_v63 = vpop.f32.mrf.mxu0  ;;  %v1356_v0 = vpop.f32.mrf.mxu1  ;;  %1413 = vst [vmem:[%s3502_s24 + $0x28] sm:$0xff] %v1405_v60 }
 0x1be   : > { %v1398_v1 = vmul.f32 %v1390_v62, %v3420_v39  ;;  %v1399_v7 = vmul.f32 %v1391_v50, %v3422_v43 }
 0x1c0   : > { %v1406_v2 = vadd.f32 %v1398_v1, %v3535_v34  ;;  %v1407_v16 = vadd.f32 %v1399_v7, %v3538_v35 }
 0x1c2   : > { %1414 = vst [vmem:[%s3502_s24 + $0x30] sm:$0xff] %v1406_v2 }
 0x1c3   : > { %v1369_v4 = vpop.f32.mrf.mxu2  ;;  %v1382_v5 = vpop.f32.mrf.mxu3  ;;  %1415 = vst [vmem:[%s3502_s24 + $0x38] sm:$0xff] %v1407_v16 }
 0x1c4   : > { %v1435_v10 = vpop.f32.mrf.mxu0  ;;  %v1448_v11 = vpop.f32.mrf.mxu1 }
 0x1cb   : > { %v1461_v15 = vpop.f32.mrf.mxu2  ;;  %v1474_v18 = vpop.f32.mrf.mxu3 }
 0x1cc   : > { %v1437_v6 = vpop.f32.mrf.mxu0  ;;  %v1450_v9 = vpop.f32.mrf.mxu1 }
 0x1d3   : > { %v1463_v19 = vpop.f32.mrf.mxu2  ;;  %v1476_v14 = vpop.f32.mrf.mxu3 }
 0x1d4   : > { %v1487_v22 = vpop.f32.mrf.mxu0  ;;  %v1500_v39 = vpop.f32.mrf.mxu1 }
 0x1db   : > { %v1513_v29 = vpop.f32.mrf.mxu2  ;;  %v1526_v43 = vpop.f32.mrf.mxu3 }
 0x1dc   : > { %v1489_v30 = vpop.f32.mrf.mxu0  ;;  %v1502_v31 = vpop.f32.mrf.mxu1 }
 0x1e3   : > { %v1515_v32 = vpop.f32.mrf.mxu2  ;;  %v1528_v37 = vpop.f32.mrf.mxu3 }
 0x1e4   : > { %v1542_v38 = vpop.f32.mrf.mxu0  ;;  %v1555_v44 = vpop.f32.mrf.mxu1 }
 0x1e5   : > { %v1543_v60 = vadd.f32 %v1542_v38, %v1435_v10  ;;  %v1556_v61 = vadd.f32 %v1555_v44, %v1448_v11 }
 0x1eb   : > { %v1568_v46 = vpop.f32.mrf.mxu2  ;;  %v1581_v20 = vpop.f32.mrf.mxu3 }
 0x1ec   : > { %v1544_v13 = vpop.f32.mrf.mxu0  ;;  %v1557_v47 = vpop.f32.mrf.mxu1  ;;  %v1569_v10 = vadd.f32 %v1568_v46, %v1461_v15  ;;  %v1582_v11 = vadd.f32 %v1581_v20, %v1474_v18 }
 0x1f3   : > { %v1570_v48 = vpop.f32.mrf.mxu2  ;;  %v1583_v54 = vpop.f32.mrf.mxu3 }
 0x1f4   : > { %v1594_v55 = vpop.f32.mrf.mxu0  ;;  %v1607_v56 = vpop.f32.mrf.mxu1 }
 0x1f5   : > { %v1595_v41 = vadd.f32 %v1594_v55, %v1487_v22  ;;  %v1608_v45 = vadd.f32 %v1607_v56, %v1500_v39 }
 0x1fb   : > { %v1620_v57 = vpop.f32.mrf.mxu2  ;;  %v1633_v8 = vpop.f32.mrf.mxu3 }
 0x1fc   : > { %v1596_v12 = vpop.f32.mrf.mxu0  ;;  %v1609_v17 = vpop.f32.mrf.mxu1  ;;  %v1621_v14 = vadd.f32 %v1620_v57, %v1513_v29  ;;  %v1634_v22 = vadd.f32 %v1633_v8, %v1526_v43 }
 0x203   : > { %v1622_v21 = vpop.f32.mrf.mxu2  ;;  %v1635_v25 = vpop.f32.mrf.mxu3 }
 0x204   : > { %v1649_v28 = vpop.f32.mrf.mxu0  ;;  %v1662_v33 = vpop.f32.mrf.mxu1 }
 0x205   : > { %v1744_v49 = vadd.f32 %v1649_v28, %v1543_v60  ;;  %v1745_v62 = vadd.f32 %v1662_v33, %v1556_v61 }
 0x207   : > { %v1752_v16 = vmul.f32 %v1744_v49, %v3489_v26  ;;  %v1753_v4 = vmul.f32 %v1745_v62, %v3492_v27 }
 0x20b   : > { %v1675_v36 = vpop.f32.mrf.mxu2  ;;  %v1688_v40 = vpop.f32.mrf.mxu3 }
 0x20c   : > { %v1651_v58 = vpop.f32.mrf.mxu0  ;;  %v1664_v3 = vpop.f32.mrf.mxu1  ;;  %v1746_v39 = vadd.f32 %v1675_v36, %v1569_v10  ;;  %v1747_v30 = vadd.f32 %v1688_v40, %v1582_v11 }
 0x20e   : > { %v1754_v27 = vmul.f32 %v1746_v39, %v3507_v51  ;;  %v1777_v51 = vmul.f32 %v3050_v53, %v3354_v59 }
 0x213   : > { %v1677_v50 = vpop.f32.mrf.mxu2  ;;  %v1690_v63 = vpop.f32.mrf.mxu3 }
 0x214   : > { %v1701_v0 = vpop.f32.mrf.mxu0  ;;  %v1714_v1 = vpop.f32.mrf.mxu1 }
 0x215   : > { %v1748_v7 = vadd.f32 %v1701_v0, %v1595_v41  ;;  %v1749_v2 = vadd.f32 %v1714_v1, %v1608_v45 }
 0x217   : > { %v1756_v5 = vmul.f32 %v1748_v7, %v3521_v23  ;;  %v1757_v6 = vmul.f32 %v1749_v2, %v3524_v24  ;;  %v1755_v23 = vmul.f32 %v1747_v30, %v3510_v52  ;;  %v1778_v52 = vsel %vm558_vm1, %v1777_v51, 0.0 }
 0x218   : > { %1779 = vadd.xlane.f32.xlu1 %v1778_v52 }
 0x219   : > { %v1760_v9 = vadd.f32 %v1756_v5, %v1752_v16  ;;  %v1761_v19 = vadd.f32 %v1757_v6, %v1753_v4 }
 0x21b   : > { %v1727_v31 = vpop.f32.mrf.mxu2  ;;  %v1740_v32 = vpop.f32.mrf.mxu3 }
 0x21c   : > { %v1750_v37 = vadd.f32 %v1727_v31, %v1621_v14  ;;  %v1751_v38 = vadd.f32 %v1740_v32, %v1634_v22  ;;  %v1703_v44 = vpop.f32.mrf.mxu0  ;;  %v1716_v26 = vpop.f32.mrf.mxu1 }
 0x21e   : > { %v1758_v24 = vmul.f32 %v1750_v37, %v3535_v34  ;;  %v1759_v15 = vmul.f32 %v1751_v38, %v3538_v35  ;;  %v504_v34 = vld [vmem:[%s421_s21] sm:$0xff]  ;;  %s1843_s21 = sshll.u32 %s1839_s28, 4  ;;  %s1844_s21 = int_to_ptr.hbm [resolvable:$true] %s1843_s21 }
 0x21f   : > { %v557_v35 = vadd.f32 %v3050_v53, %v504_v34  ;;  %s2547_s30 = sshra.s32 %s1844_s21, 4  ;;  %s2548_s30 = int_to_ptr.hbm [resolvable:$true] %s2547_s30 }
 0x220   : > { %v1762_v18 = vadd.f32 %v1758_v24, %v1754_v27  ;;  %v1763_v29 = vadd.f32 %v1759_v15, %v1755_v23  ;;  %s2549_s26 = scalar_lea.hbm %s2548_s30, 8  ;;  %p2554_p4 = scmp.lt.s32.totalorder %s2548_s30, %s3675_s23 }
 0x221   : > { %v1783_v48 = vmul.f32 %v557_v35, %v3354_v59  ;;  %559 = vst.msk [vmem:[%s488_s19] sm:$0xff] %vm558_vm1, %v557_v35  ;;  %p2550_p13 = scmp.ne.s32.totalorder %s2548_s30, %s2549_s26  ;;  %p2555_p5 = scmp.lt.s32.totalorder %s2553_s17, %s2549_s26 }
 0x222   : > { %v1764_v43 = vadd.f32 %v1762_v18, %v1760_v9  ;;  %v1765_v46 = vadd.f32 %v1763_v29, %v1761_v19 }
 0x223   : > { %v1729_v20 = vpop.f32.mrf.mxu2  ;;  %v1742_v13 = vpop.f32.mrf.mxu3  ;;  %v1784_v54 = vsel %vm558_vm1, %v1783_v48, 0.0  ;;  %p2551_p2 = pnand %p2550_p13, %p2769_p11  ;;  %p2556_p7 = por %p2555_p5, %p2554_p4 }
 0x224   : > { %v1766_v47 = vadd.f32 %v1765_v46, %v1764_v43 }
 0x225   : > { %p2552_p3 = pneg %p2551_p2 }
 0x226   : > { %1768 = vrot.lane.b32.xlu0 %v1766_v47, %s2669_s27 }
 0x227   : > { %p2557_p0 = pnand %p2556_p7, %p2552_p3 }
 0x250   : > { %1785 = vadd.xlane.f32.xlu0 %v1784_v54 }
 0x251   : > { %2560 = shalt.err (!%p2557_p0)
}
 0x252   : > { %2343 = dma.vmem_to_hbm [thread:$0]  (%p2769_p11), %s1842_s2, 128, %s1844_s21, %s3572_s7  }
 0x253   : > { %s2333_s25 = sshll.u32 %s2742_s13, 6  ;;  %s1856_s19 = sshll.u32 %s3502_s24, 4  ;;  %s1857_s19 = int_to_ptr.vmem [resolvable:$true] %s1856_s19 }
 0x254   : > { %s2670_s16 = smov 96   ;;  %s3676_s28 = sld [smem:[#allocation27_spill]] }
 0x25a   : > { %s1854_s30 = scalar_lea.hbm %s3676_s28, %s2333_s25  ;;  %s2581_s24 = scalar_lea.hbm %s3676_s28, 128 }
 0x25b   : > { %s1858_s26 = sshll.u32 %s1854_s30, 4  ;;  %s1859_s26 = int_to_ptr.hbm [resolvable:$true] %s1858_s26 }
 0x25c   : > { %s2575_s8 = sshra.s32 %s1859_s26, 4  ;;  %s2576_s8 = int_to_ptr.hbm [resolvable:$true] %s2575_s8 }
 0x25d   : > { %s2577_s18 = scalar_lea.hbm %s2576_s8, 64  ;;  %p2582_p6 = scmp.lt.s32.totalorder %s2576_s8, %s3676_s28 }
 0x25e   : > { %p2578_p8 = scmp.ne.s32.totalorder %s2576_s8, %s2577_s18  ;;  %p2583_p13 = scmp.lt.s32.totalorder %s2581_s24, %s2577_s18 }
 0x260   : > { %p2579_p10 = pnand %p2578_p8, %p2769_p11  ;;  %p2584_p2 = por %p2583_p13, %p2582_p6 }
 0x262   : > { %p2580_p1 = pneg %p2579_p10 }
 0x264   : > { %p2585_p3 = pnand %p2584_p2, %p2580_p1 }
 0x298   : > { %v1769_v53 = vpop.permute.xlu0 %1768 }
 0x299   : > { %v1771_v59 = vadd.f32 %v1769_v53, %v1766_v47 }
 0x29b   : > { %1773 = vrot.lane.b32.xlu1 %v1771_v59, %s2670_s16 }
 0x29c   : > { %2588 = shalt.err (!%p2585_p3)
}
 0x29d   : > { %2344 = dma.vmem_to_hbm [thread:$0]  (%p2769_p11), %s1857_s19, 1024, %s1859_s26, %s3572_s7   ;;  %v1780_v17 = vpop.xlane.xlu1 %1779 }
 0x29e   : > { %s3677_s16 = sld [smem:[#allocation25_spill]]  ;;  %v1781_v58 = vmul.f32 %v1780_v17, %v3205_v42  ;;  %s481_s19 = scalar_lea.vmem [#allocation10], %s2877_s29 }
 0x29f   : > { %s1827_s9 = sshll.u32 %s481_s19, 4  ;;  %s1805_s13 = scalar_lea.sflag [#allocation4], %s2874_s22  ;;  %s1828_s9 = int_to_ptr.vmem [resolvable:$true] %s1827_s9 }
 0x2a4   : > { %s1825_s7 = scalar_lea.hbm %s3677_s16, %s2294_s14  ;;  %s2609_s29 = scalar_lea.hbm %s3677_s16, 16 }
 0x2a5   : > { %s1829_s11 = sshll.u32 %s1825_s7, 4  ;;  %s1830_s11 = int_to_ptr.hbm [resolvable:$true] %s1829_s11 }
 0x2a6   : > { %s2603_s14 = sshra.s32 %s1830_s11, 4  ;;  %s2604_s14 = int_to_ptr.hbm [resolvable:$true] %s2603_s14 }
 0x2a7   : > { %s2605_s30 = scalar_lea.hbm %s2604_s14, 8  ;;  %p2610_p0 = scmp.lt.s32.totalorder %s2604_s14, %s3677_s16 }
 0x2a8   : > { %p2606_p4 = scmp.ne.s32.totalorder %s2604_s14, %s2605_s30  ;;  %p2611_p8 = scmp.lt.s32.totalorder %s2609_s29, %s2605_s30 }
 0x2aa   : > { %p2607_p5 = pnand %p2606_p4, %p2769_p11  ;;  %p2612_p10 = por %p2611_p8, %p2610_p0 }
 0x2ac   : > { %p2608_p7 = pneg %p2607_p5 }
 0x2ae   : > { %p2613_p1 = pnand %p2612_p10, %p2608_p7 }
 0x2c3   : > { %v1786_v55 = vpop.xlane.xlu0 %1785 }
 0x2c4   : > { %v1787_v56 = vadd.f32 1e-06, %v1786_v55 }
 0x2c6   : > { %2411 = vrcp.f32 %v1787_v56  ;;  %vm1793_vm3 = vweird.f32 %v1787_v56  ;;  %v1799_v25 = vand.u32 2147483648, %v1787_v56  ;;  %v1797_v33 = vand.u32 2147483647, %v1787_v56 }
 0x2c8   : > { %v1800_v40 = vor.u32 1.1754944e-38, %v1799_v25  ;;  %vm1798_vm6 = vcmp.eq.f32.partialorder %v1797_v33, 8.507059e+37 }
 0x2cc   : > { %v2412_v57 = vpop.eup %2411 }
 0x2cd   : > { %v1789_v8 = vmul.f32 %v2412_v57, %v1787_v56  ;;  %vm1794_vm4 = vweird.f32 %v2412_v57 }
 0x2ce   : > { %vm1795_vm5 = vmor %vm1793_vm3, %vm1794_vm4 }
 0x2cf   : > { %v1790_v12 = vsub.f32 1.0, %v1789_v8 }
 0x2d1   : > { %v1791_v21 = vmul.f32 %v2412_v57, %v1790_v12 }
 0x2d3   : > { %v1792_v28 = vadd.f32 %v2412_v57, %v1791_v21 }
 0x2d5   : > { %v1796_v60 = vsel %vm1795_vm5, %v2412_v57, %v1792_v28 }
 0x2d6   : > { %v1801_v41 = vsel %vm1798_vm6, %v1800_v40, %v1796_v60 }
 0x30d   : > { %v1774_v36 = vpop.permute.xlu1 %1773 }
 0x30e   : > { %v1776_v3 = vadd.f32 %v1774_v36, %v1771_v59 }
 0x310   : > { %v1782_v61 = vadd.f32 %v1781_v58, %v1776_v3 }
 0x312   : > { %v1802_v45 = vmul.f32 %v1801_v41, %v1782_v61 }
 0x314   : > { %1803 = vst.msk [vmem:[%s481_s19] sm:$0xff] %vm558_vm1, %v1802_v45 }
 0x315   : > { %2616 = shalt.err (!%p2613_p1)
}
 0x316   : > { %2342 = dma.vmem_to_hbm [thread:$0]  (%p2769_p11), %s1828_s9, 128, %s1830_s11, %s1805_s13  }
 0x317 PF: > { %s3678_s22 = sld [smem:[#allocation19_spill]]  ;;  %p2362_p6 = pnand %p2072_p9, %p2773_p12 }
 0x319   : > { %p2363_p13 = pneg %p2362_p6 }
 0x31d   : > { %s1870_s24 = sand.u32 1, %s3678_s22  }
 0x31e   : > { %s1871_s17 = scalar_lea.sflag [#allocation4], %s1870_s24 }
 0x31f   : > { %2646 = dma.done.wait (%p2363_p13), %s1871_s17, 128  }
 0x320   : > { %2648 = vsyncadd (%p2363_p13), %s1871_s17, 4294967168  ;;  %s3680_s15 = sadd.s32 4294967294, %s2667_s12  }
 0x321   : > { %s1880_s27 = sand.u32 1, %s3680_s15  }
 0x322   : > { %s1881_s25 = scalar_lea.sflag [#allocation12], %s1880_s27 }
 0x323   : > { %2650 = dma.done.wait (%p2363_p13), %s1881_s25, 1152  }
 0x324   : > { %2652 = vsyncadd (%p2363_p13), %s1881_s25, 4294966144  ;;  %s3681_s12 = sld [smem:[#allocation21_spill]]  ;;  %s3684_s30 = smov %s2659_s10 }
 0x325   : > { %s3682_s20 = sld [smem:[#allocation20_spill]] }
 0x326   : > { %s3683_s11 = sld [smem:[#allocation22_spill]] }
 0x32a   : > { %p32_p11 = scmp.ge.s32.totalorder %s3681_s12, 4  }
 0x32b   : > { %s3685_s10 = smov %s3682_s20 }
 0x32c   :  { %34 = sbr.rel (!%p32_p11) target bundleno = 16 (0x10), region = 165 }
 0x331   :  { %1897 = vsyncpa [#allocation3], 1 }
 0x332   :  { %1899 = vsyncpa [#allocation3 + $0x1], 1 }
 0x333   :  { %1900 = vsyncpa [#allocation6], 1 }
 0x334   :  { %1902 = vsyncpa [#allocation6 + $0x1], 1 }
 0x335   :  { %1903 = vsyncpa [#allocation9], 1 }
 0x336   :  { %1905 = vsyncpa [#allocation9 + $0x1], 1 }
 0x337   :  { %1906 = vsyncpa [#allocation4], 1 }
 0x338   :  { %1908 = vsyncpa [#allocation4 + $0x1], 1 }
 0x339   :  { %1909 = vsyncpa [#allocation12], 1 }
 0x33a   :  { %1911 = vsyncpa [#allocation12 + $0x1], 1 }

</bundles_post_ra>
